<compile_context>
chip_gen: v7x
topology: tpu7x:2x2x1
jax: 0.10.0
libtpu: 0.0.40
codegen_flags: <defaults>
</compile_context>

<pallas_src>
import functools

import jax
import jax.numpy as jnp
from jax.experimental import pallas as pl
from jax.experimental.pallas import tpu as pltpu

_LANES = 128          # lane width: channels are zero-padded to this


def _round_up(x, m):
    return (x + m - 1) // m * m


def _encoder_fused_kernel(x_ref, w_ref, b_ref, o_ref, buf0, buf1, pack, *,
                          layer_cfg, c_in, t0):
    """All ConvReLURes layers for one batch element, VMEM-resident.

    x_ref : (1, t0, c_in)        f32  input block (channels-last, unpadded)
    w_ref : (W_rows, 128)        cd   per-layer weight blocks (see wrapper)
    b_ref : (n_layers, 128)      f32  channel-padded biases
    o_ref : (1, T_final, 128)    f32  lane-dense output (channel-cropped later)
    buf0  : (t_buf0, 128)        f32  ping activation scratch (even-layer src)
    buf1  : (t_buf1, 128)        cd   pong activation scratch (odd-layer src)
    pack  : (t_pack, 128)        cd   dense-contraction staging buffer
    """
    cd = w_ref.dtype

    # ---- stage input -------------------------------------------------------
    # Padded lanes must be *finite zeros*: they are contracted against zero
    # weight rows and an uninitialized NaN would otherwise poison the matmul.
    # Only rows [0:t0] are ever read, so only they are zeroed (review item).
    buf0[pl.ds(0, t0), :] = jnp.zeros((t0, _LANES), jnp.float32)
    buf0[pl.ds(0, t0), pl.ds(0, c_in)] = x_ref[0]
    # One-time zero of the packing buffer (lanes above K*ci must be finite).
    pack[...] = jnp.zeros_like(pack)

    # NOTE: buf1 is intentionally never zeroed.  Invariant: every row a layer
    # reads was fully written by the previous layer (lengths strictly shrink),
    # and any stale-but-finite lanes only ever hit zero weight rows.  Keep this
    # invariant if the stack configuration changes.

    bufs = (buf0, buf1)
    n_layers = len(layer_cfg)
    for li, (K, ci, stride, do_res, packed, w_off, t_out) in enumerate(layer_cfg):
        src = bufs[li % 2]
        res_rows = None

        if K == 1:
            # 1x1 conv: the source rows are already the dense operand
            # (channels at lanes [0:ci], zeros elsewhere -> zero weight rows).
            rows = src[pl.ds(0, t_out), :]
            acc = jnp.dot(rows.astype(cd), w_ref[pl.ds(w_off, _LANES), :],
                          preferred_element_type=jnp.float32)
            res_rows = rows
        elif packed:
            # Dense contraction: tap k's channels live at lanes [k*ci,(k+1)*ci)
            # of the packing buffer (one masked lane-offset store per tap),
            # so the whole layer is ONE depth-128 MXU push instead of K.
            if stride == 1:
                for k in range(K):
                    tap = src[pl.ds(k, t_out), pl.ds(0, ci)]
                    pack[pl.ds(0, t_out), pl.ds(k * ci, ci)] = tap.astype(cd)
            else:  # stride == 2: de-interleave once (2 strided reads, not K)
                v_even = src[pl.ds(0, t_out + 1, stride=stride), :]
                v_odd = src[pl.ds(1, t_out + 1, stride=stride), :]
                halves = (v_even, v_odd)
                for k in range(K):
                    tap = halves[k % 2][k // 2:k // 2 + t_out, :ci]
                    pack[pl.ds(0, t_out), pl.ds(k * ci, ci)] = tap.astype(cd)
            a = pack[pl.ds(0, t_out), :]
            acc = jnp.dot(a, w_ref[pl.ds(w_off, _LANES), :],
                          preferred_element_type=jnp.float32)
        else:
            # Fallback (K*ci > 128): per-tap matmul accumulation; no im2col
            # concatenate and no whole-row cast temporaries (review item).
            acc = jnp.zeros((t_out, _LANES), jnp.float32)
            for k in range(K):
                if stride == 1:
                    tap = src[pl.ds(k, t_out), :]
                else:
                    tap = src[pl.ds(k, t_out, stride=stride), :]
                w_k = w_ref[pl.ds(w_off + k * _LANES, _LANES), :]
                acc = acc + jnp.dot(tap.astype(cd), w_k,
                                    preferred_element_type=jnp.float32)

        acc = acc + b_ref[pl.ds(li, 1), :]                 # + bias (f32)
        act = jnp.maximum(acc, 0.0)                        # ReLU (f32)
        if do_res:                                         # post-ReLU residual
            l_off = (K - 1) // 2
            if res_rows is None:
                res_rows = src[pl.ds(l_off, t_out), :]
            act = act + res_rows.astype(jnp.float32)

        if li == n_layers - 1:
            o_ref[0] = act.astype(o_ref.dtype)
        else:
            dst = bufs[(li + 1) % 2]
            dst[pl.ds(0, t_out), :] = act.astype(dst.dtype)


# --- Encoder stack configuration (mirrors Encoder.__init__) -------------------
_STACK_FILTER_SZ = [3, 3, 4, 3, 3, 1, 1, 1, 1]
_STACK_STRIDES   = [1, 1, 2, 1, 1, 1, 1, 1, 1]
_STACK_RESIDUAL  = [False, True, False, True, True, True, True, True, True]


def init_encoder_params(key, n_in, n_out):
    """Xavier-style init; weights stored tap-major as (K, C_in, C_out)."""
    stack_in_chan = [n_in] + [n_out] * 8
    params = []
    for c_in, k, s, res in zip(stack_in_chan, _STACK_FILTER_SZ,
                               _STACK_STRIDES, _STACK_RESIDUAL):
        key, wk, bk = jax.random.split(key, 3)
        fan_in = c_in * k
        fan_out = n_out * k
        bound = (6.0 / (fan_in + fan_out)) ** 0.5      # xavier_uniform
        w = jax.random.uniform(wk, (k, c_in, n_out), jnp.float32, -bound, bound)
        bb = 1.0 / (fan_in ** 0.5)
        b = jax.random.uniform(bk, (n_out,), jnp.float32, -bb, bb)
        params.append(dict(w=w, b=b, stride=s, do_res=res))
    return params


def encoder_forward(params, mels_bct, *, compute_dtype=jnp.bfloat16):
    """mels_bct: (B, n_mels, T) NCW -> (B, n_out, T_out) NCW (matches torch Encoder)."""
    B, c_in, T = mels_bct.shape
    c_out = params[0]["w"].shape[2]
    assert c_in <= _LANES and c_out <= _LANES

    # Static per-layer config + weight / bias blocks.
    layer_cfg, w_blocks, b_rows = [], [], []
    t, w_off, pack_rows = T, 0, 8
    for li, p in enumerate(params):
        K, ci, co = p["w"].shape
        stride, do_res = int(p["stride"]), bool(p["do_res"])
        if do_res:
            # torch ConvReLURes raises for stride != 1; residual needs ci == co.
            assert stride == 1 and ci == co
        t_out = (t - K) // stride + 1
        assert t_out >= 1
        if stride != 1:
            # strided sublane reads happen on the f32 ping buffer; the fixed
            # encoder topology guarantees the strided layer has even index.
            assert li % 2 == 0, "strided layer must read the f32 ping buffer"
        packed = (K * ci <= _LANES) and (stride in (1, 2))
        if packed:
            # dense-contraction block: rows [k*ci,(k+1)*ci) hold tap k.
            blk = jnp.pad(p["w"], ((0, 0), (0, 0), (0, _LANES - co)))
            blk = blk.reshape(K * ci, _LANES)
            blk = jnp.pad(blk, ((0, _LANES - K * ci), (0, 0)))      # (128, 128)
            if K > 1:
                pack_rows = max(pack_rows, _round_up(t_out, 8))
        else:
            # per-tap blocks: rows [k*128 + c] hold w[k, c, :].
            blk = jnp.pad(p["w"], ((0, 0), (0, _LANES - ci), (0, _LANES - co)))
            blk = blk.reshape(K * _LANES, _LANES)
        layer_cfg.append((K, ci, stride, do_res, packed, w_off, t_out))
        w_blocks.append(blk)
        b_rows.append(jnp.pad(p["b"], (0, _LANES - co)))
        w_off += blk.shape[0]
        t = t_out
    t_final = t
    w2d = jnp.concatenate(w_blocks, axis=0).astype(compute_dtype)   # MXU operands
    b2d = jnp.stack(b_rows, axis=0).astype(jnp.float32)

    # TODO(synk): lane-dense input path (keep NCW in HBM, transpose the tiny
    # c_in x T slab in-kernel) would remove this wrapper transpose.
    x_btc = jnp.transpose(mels_bct, (0, 2, 1)).astype(jnp.float32)

    t_buf0 = _round_up(T, 8)                       # ping: staged input dominates
    t_buf1 = _round_up(layer_cfg[0][6], 8)         # pong: layer-0 output dominates
    itemsize = jnp.dtype(compute_dtype).itemsize

    # Explicit VMEM budget (review item): scratch + double-buffered blocks.
    scratch_bytes = (t_buf0 * _LANES * 4
                     + t_buf1 * _LANES * itemsize
                     + pack_rows * _LANES * itemsize)
    block_bytes = 2 * (T * c_in * 4 + t_final * _LANES * 4
                       + w2d.size * itemsize + b2d.size * 4)
    vmem_limit = int(min(128 * 1024 * 1024,
                         max(32 * 1024 * 1024,
                             scratch_bytes + block_bytes + (4 << 20))))

    kernel = functools.partial(_encoder_fused_kernel,
                               layer_cfg=tuple(layer_cfg), c_in=c_in, t0=T)

    out = pl.pallas_call(
        kernel,
        out_shape=jax.ShapeDtypeStruct((B, t_final, _LANES), jnp.float32),
        grid_spec=pltpu.PrefetchScalarGridSpec(
            num_scalar_prefetch=0,
            grid=(B,),
            in_specs=[
                pl.BlockSpec((1, T, c_in), lambda b: (b, 0, 0)),
                # grid-invariant weight / bias blocks (loaded once)
                pl.BlockSpec((w2d.shape[0], _LANES), lambda b: (0, 0)),
                pl.BlockSpec((b2d.shape[0], _LANES), lambda b: (0, 0)),
            ],
            out_specs=pl.BlockSpec((1, t_final, _LANES), lambda b: (b, 0, 0)),
            scratch_shapes=[
                pltpu.VMEM((t_buf0, _LANES), jnp.float32),     # ping (f32: strided reads)
                pltpu.VMEM((t_buf1, _LANES), compute_dtype),   # pong (bf16)
                pltpu.VMEM((pack_rows, _LANES), compute_dtype),  # dense-pack staging
            ],
        ),
        # TODO(synk): add a halo'd time-tile "parallel" axis for v7x megacore
        # and very long sequences (16-input-frame receptive field).
        compiler_params=pltpu.CompilerParams(
            dimension_semantics=("parallel",),
            vmem_limit_bytes=vmem_limit,
        ),
    )(x_btc, w2d, b2d)

    # Crop padded channels (exact zeros) and return NCW like torch.
    return jnp.transpose(out[:, :, :c_out], (0, 2, 1))


def _reference_forward(params, mels_bct):
    """Pure-JAX f32 reference of the torch Encoder forward (self-check only)."""
    x = mels_bct.astype(jnp.float32)                       # (B, C, T)
    for p in params:
        w, b = p["w"], p["b"]
        s, do_res = int(p["stride"]), bool(p["do_res"])
        K = w.shape[0]
        T_in = x.shape[2]
        T_out = (T_in - K) // s + 1
        acc = jnp.zeros((x.shape[0], w.shape[2], T_out), jnp.float32)
        for k in range(K):
            xk = x[:, :, k:k + s * (T_out - 1) + 1:s]      # (B, C_in, T_out)
            acc = acc + jnp.einsum("bct,cd->bdt", xk, w[k])
        acc = acc + b[None, :, None]
        act = jnp.maximum(acc, 0.0)
        if do_res:
            l_off = (K - 1) // 2
            act = act + x[:, :, l_off:l_off + T_out]
        x = act
    # TODO(synk): frac_zero_act / update_metrics are module-attribute side
    # effects, not part of the returned output; not reproduced.
    return x


if __name__ == "__main__":
    key = jax.random.PRNGKey(0)
    B, n_mels, n_out, T = 2, 4, 32, 32

    pkey, xkey = jax.random.split(key)
    params = init_encoder_params(pkey, n_mels, n_out)
    mels = jax.random.normal(xkey, (B, n_mels, T), jnp.float32)

    # Expected time shrinkage: 32 ->30 ->28 ->(k4,s2)13 ->11 ->9 ->9 ->9 ->9 ->9
    ref = _reference_forward(params, mels)

    # 1) f32-compute variant: tight structural check (catches packing/layout bugs).
    out_f32 = jax.block_until_ready(
        encoder_forward(params, mels, compute_dtype=jnp.float32))
    assert out_f32.shape == (B, n_out, 9), out_f32.shape
    err32 = float(jnp.max(jnp.abs(out_f32 - ref)))
    assert jnp.allclose(out_f32, ref, rtol=5e-2, atol=5e-2), err32

    # 2) bf16 production variant (MXU-native): looser numerical check.
    out = jax.block_until_ready(encoder_forward(params, mels))
    assert out.shape == (B, n_out, 9), out.shape
    assert out.dtype == jnp.float32
    assert bool(jnp.isfinite(out).all())
    err16 = float(jnp.max(jnp.abs(out - ref)))
    assert jnp.allclose(out, ref, rtol=1.5e-1, atol=1.5e-1), err16

    print("KERNEL_OK")
</pallas_src>

<mosaic_0001>
module attributes {stable_mosaic.version = 11 : i64} {
  func.func @_encoder_fused_kernel(%arg0: i32, %arg1: memref<1x32x4xf32, #tpu.memory_space<vmem>>, %arg2: memref<1152x128xf32, #tpu.memory_space<vmem>>, %arg3: memref<9x128xf32, #tpu.memory_space<vmem>>, %arg4: memref<1x9x128xf32, #tpu.memory_space<vmem>>, %arg5: memref<32x128xf32, #tpu.memory_space<vmem>>, %arg6: memref<32x128xf32, #tpu.memory_space<vmem>>, %arg7: memref<32x128xf32, #tpu.memory_space<vmem>>) attributes {dimension_semantics = [#tpu.dimension_semantics<parallel>], iteration_bounds = array<i64: 2>, scalar_prefetch = 0 : i64, scratch_operands = 3 : i64, tpu.core_type = #tpu.core_type<tc>, window_params = [{transform_indices = @transform_0, window_bounds = array<i64: 1, 32, 4>}, {pipeline_mode = #tpu.pipeline_mode<synchronous>, transform_indices = @transform_1, window_bounds = array<i64: 1152, 128>}, {pipeline_mode = #tpu.pipeline_mode<synchronous>, transform_indices = @transform_2, window_bounds = array<i64: 9, 128>}, {transform_indices = @transform_3, window_bounds = array<i64: 1, 9, 128>}]} {
    %cst = arith.constant 0.000000e+00 : f32
    %0 = vector.broadcast %cst : f32 to vector<32x128xf32>
    %c0 = arith.constant 0 : index
    %c0_0 = arith.constant 0 : index
    %1 = vector.load %arg5[%c0, %c0_0] : memref<32x128xf32, #tpu.memory_space<vmem>>, vector<32x128xf32>
    tpu.vector_store %arg5[%c0, %c0_0], %0 {strides = array<i32>} : memref<32x128xf32, #tpu.memory_space<vmem>>, vector<32x128xf32>,
    %c0_1 = arith.constant 0 : index
    %c0_2 = arith.constant 0 : index
    %c0_3 = arith.constant 0 : index
    %2 = vector.load %arg1[%c0_1, %c0_2, %c0_3] : memref<1x32x4xf32, #tpu.memory_space<vmem>>, vector<1x32x4xf32>
    %3 = vector.shape_cast %2 : vector<1x32x4xf32> to vector<32x4xf32>
    %c0_4 = arith.constant 0 : index
    %c0_5 = arith.constant 0 : index
    %4 = vector.load %arg5[%c0_4, %c0_5] : memref<32x128xf32, #tpu.memory_space<vmem>>, vector<32x4xf32>
    tpu.vector_store %arg5[%c0_4, %c0_5], %3 {strides = array<i32>} : memref<32x128xf32, #tpu.memory_space<vmem>>, vector<32x4xf32>,
    %cst_6 = arith.constant 0.000000e+00 : f32
    %5 = vector.broadcast %cst_6 : f32 to vector<32x128xf32>
    %c0_7 = arith.constant 0 : index
    %c0_8 = arith.constant 0 : index
    %6 = vector.load %arg7[%c0_7, %c0_8] : memref<32x128xf32, #tpu.memory_space<vmem>>, vector<32x128xf32>
    tpu.vector_store %arg7[%c0_7, %c0_8], %5 {strides = array<i32>} : memref<32x128xf32, #tpu.memory_space<vmem>>, vector<32x128xf32>,
    %c0_9 = arith.constant 0 : index
    %c0_10 = arith.constant 0 : index
    %7 = vector.load %arg5[%c0_9, %c0_10] : memref<32x128xf32, #tpu.memory_space<vmem>>, vector<30x4xf32>
    %c0_11 = arith.constant 0 : index
    %c0_12 = arith.constant 0 : index
    %8 = vector.load %arg7[%c0_11, %c0_12] : memref<32x128xf32, #tpu.memory_space<vmem>>, vector<30x4xf32>
    tpu.vector_store %arg7[%c0_11, %c0_12], %7 {strides = array<i32>} : memref<32x128xf32, #tpu.memory_space<vmem>>, vector<30x4xf32>,
    %c1 = arith.constant 1 : index
    %c0_13 = arith.constant 0 : index
    %9 = vector.load %arg5[%c1, %c0_13] : memref<32x128xf32, #tpu.memory_space<vmem>>, vector<30x4xf32>
    %c0_14 = arith.constant 0 : index
    %c4 = arith.constant 4 : index
    %10 = vector.load %arg7[%c0_14, %c4] : memref<32x128xf32, #tpu.memory_space<vmem>>, vector<30x4xf32>
    tpu.vector_store %arg7[%c0_14, %c4], %9 {strides = array<i32>} : memref<32x128xf32, #tpu.memory_space<vmem>>, vector<30x4xf32>,
    %c2 = arith.constant 2 : index
    %c0_15 = arith.constant 0 : index
    %11 = vector.load %arg5[%c2, %c0_15] : memref<32x128xf32, #tpu.memory_space<vmem>>, vector<30x4xf32>
    %c0_16 = arith.constant 0 : index
    %c8 = arith.constant 8 : index
    %12 = vector.load %arg7[%c0_16, %c8] : memref<32x128xf32, #tpu.memory_space<vmem>>, vector<30x4xf32>
    tpu.vector_store %arg7[%c0_16, %c8], %11 {strides = array<i32>} : memref<32x128xf32, #tpu.memory_space<vmem>>, vector<30x4xf32>,
    %c0_17 = arith.constant 0 : index
    %c0_18 = arith.constant 0 : index
    %13 = vector.load %arg7[%c0_17, %c0_18] : memref<32x128xf32, #tpu.memory_space<vmem>>, vector<30x128xf32>
    %c0_19 = arith.constant 0 : index
    %c0_20 = arith.constant 0 : index
    %14 = vector.load %arg2[%c0_19, %c0_20] : memref<1152x128xf32, #tpu.memory_space<vmem>>, vector<128x128xf32>
    %cst_21 = arith.constant dense<0.000000e+00> : vector<30x128xf32>
    %15 = tpu.matmul %13, %14, %cst_21 {dimension_numbers = #tpu.dot_dimension_numbers<[1], [0], [0], [1], [0, 0, 1, 1], [], []>} : vector<30x128xf32>, vector<128x128xf32>, vector<30x128xf32> -> vector<30x128xf32>
    %c0_22 = arith.constant 0 : index
    %c0_23 = arith.constant 0 : index
    %16 = vector.load %arg3[%c0_22, %c0_23] : memref<9x128xf32, #tpu.memory_space<vmem>>, vector<1x128xf32>
    %17 = vector.broadcast %16 : vector<1x128xf32> to vector<30x128xf32>
    %18 = arith.addf %15, %17 : vector<30x128xf32>
    %cst_24 = arith.constant 0.000000e+00 : f32
    %19 = vector.broadcast %cst_24 : f32 to vector<30x128xf32>
    %20 = arith.maximumf %18, %19 : vector<30x128xf32>
    %c0_25 = arith.constant 0 : index
    %c0_26 = arith.constant 0 : index
    %21 = vector.load %arg6[%c0_25, %c0_26] : memref<32x128xf32, #tpu.memory_space<vmem>>, vector<30x128xf32>
    tpu.vector_store %arg6[%c0_25, %c0_26], %20 {strides = array<i32>} : memref<32x128xf32, #tpu.memory_space<vmem>>, vector<30x128xf32>,
    %c0_27 = arith.constant 0 : index
    %c0_28 = arith.constant 0 : index
    %22 = vector.load %arg6[%c0_27, %c0_28] : memref<32x128xf32, #tpu.memory_space<vmem>>, vector<28x32xf32>
    %c0_29 = arith.constant 0 : index
    %c0_30 = arith.constant 0 : index
    %23 = vector.load %arg7[%c0_29, %c0_30] : memref<32x128xf32, #tpu.memory_space<vmem>>, vector<28x32xf32>
    tpu.vector_store %arg7[%c0_29, %c0_30], %22 {strides = array<i32>} : memref<32x128xf32, #tpu.memory_space<vmem>>, vector<28x32xf32>,
    %c1_31 = arith.constant 1 : index
    %c0_32 = arith.constant 0 : index
    %24 = vector.load %arg6[%c1_31, %c0_32] : memref<32x128xf32, #tpu.memory_space<vmem>>, vector<28x32xf32>
    %c0_33 = arith.constant 0 : index
    %c32 = arith.constant 32 : index
    %25 = vector.load %arg7[%c0_33, %c32] : memref<32x128xf32, #tpu.memory_space<vmem>>, vector<28x32xf32>
    tpu.vector_store %arg7[%c0_33, %c32], %24 {strides = array<i32>} : memref<32x128xf32, #tpu.memory_space<vmem>>, vector<28x32xf32>,
    %c2_34 = arith.constant 2 : index
    %c0_35 = arith.constant 0 : index
    %26 = vector.load %arg6[%c2_34, %c0_35] : memref<32x128xf32, #tpu.memory_space<vmem>>, vector<28x32xf32>
    %c0_36 = arith.constant 0 : index
    %c64 = arith.constant 64 : index
    %27 = vector.load %arg7[%c0_36, %c64] : memref<32x128xf32, #tpu.memory_space<vmem>>, vector<28x32xf32>
    tpu.vector_store %arg7[%c0_36, %c64], %26 {strides = array<i32>} : memref<32x128xf32, #tpu.memory_space<vmem>>, vector<28x32xf32>,
    %c0_37 = arith.constant 0 : index
    %c0_38 = arith.constant 0 : index
    %28 = vector.load %arg7[%c0_37, %c0_38] : memref<32x128xf32, #tpu.memory_space<vmem>>, vector<28x128xf32>
    %c128 = arith.constant 128 : index
    %c0_39 = arith.constant 0 : index
    %29 = vector.load %arg2[%c128, %c0_39] : memref<1152x128xf32, #tpu.memory_space<vmem>>, vector<128x128xf32>
    %cst_40 = arith.constant dense<0.000000e+00> : vector<28x128xf32>
    %30 = tpu.matmul %28, %29, %cst_40 {dimension_numbers = #tpu.dot_dimension_numbers<[1], [0], [0], [1], [0, 0, 1, 1], [], []>} : vector<28x128xf32>, vector<128x128xf32>, vector<28x128xf32> -> vector<28x128xf32>
    %c1_41 = arith.constant 1 : index
    %c0_42 = arith.constant 0 : index
    %31 = vector.load %arg3[%c1_41, %c0_42] : memref<9x128xf32, #tpu.memory_space<vmem>>, vector<1x128xf32>
    %32 = vector.broadcast %31 : vector<1x128xf32> to vector<28x128xf32>
    %33 = arith.addf %30, %32 : vector<28x128xf32>
    %cst_43 = arith.constant 0.000000e+00 : f32
    %34 = vector.broadcast %cst_43 : f32 to vector<28x128xf32>
    %35 = arith.maximumf %33, %34 : vector<28x128xf32>
    %c1_44 = arith.constant 1 : index
    %c0_45 = arith.constant 0 : index
    %36 = vector.load %arg6[%c1_44, %c0_45] : memref<32x128xf32, #tpu.memory_space<vmem>>, vector<28x128xf32>
    %37 = arith.addf %35, %36 : vector<28x128xf32>
    %c0_46 = arith.constant 0 : index
    %c0_47 = arith.constant 0 : index
    %38 = vector.load %arg5[%c0_46, %c0_47] : memref<32x128xf32, #tpu.memory_space<vmem>>, vector<28x128xf32>
    tpu.vector_store %arg5[%c0_46, %c0_47], %37 {strides = array<i32>} : memref<32x128xf32, #tpu.memory_space<vmem>>, vector<28x128xf32>,
    %c0_48 = arith.constant 0 : index
    %c0_49 = arith.constant 0 : index
    %39 = tpu.strided_load %arg5[%c0_48, %c0_49] {strides = array<i32: 2, 1>} : memref<32x128xf32, #tpu.memory_space<vmem>>, vector<14x128xf32>
    %c1_50 = arith.constant 1 : index
    %c0_51 = arith.constant 0 : index
    %40 = tpu.strided_load %arg5[%c1_50, %c0_51] {strides = array<i32: 2, 1>} : memref<32x128xf32, #tpu.memory_space<vmem>>, vector<14x128xf32>
    %41 = vector.extract_strided_slice %39 {offsets = [0, 0], sizes = [13, 32], strides = [1, 1]} : vector<14x128xf32> to vector<13x32xf32>
    %c0_52 = arith.constant 0 : index
    %c0_53 = arith.constant 0 : index
    %42 = vector.load %arg7[%c0_52, %c0_53] : memref<32x128xf32, #tpu.memory_space<vmem>>, vector<13x32xf32>
    tpu.vector_store %arg7[%c0_52, %c0_53], %41 {strides = array<i32>} : memref<32x128xf32, #tpu.memory_space<vmem>>, vector<13x32xf32>,
    %43 = vector.extract_strided_slice %40 {offsets = [0, 0], sizes = [13, 32], strides = [1, 1]} : vector<14x128xf32> to vector<13x32xf32>
    %c0_54 = arith.constant 0 : index
    %c32_55 = arith.constant 32 : index
    %44 = vector.load %arg7[%c0_54, %c32_55] : memref<32x128xf32, #tpu.memory_space<vmem>>, vector<13x32xf32>
    tpu.vector_store %arg7[%c0_54, %c32_55], %43 {strides = array<i32>} : memref<32x128xf32, #tpu.memory_space<vmem>>, vector<13x32xf32>,
    %45 = vector.extract_strided_slice %39 {offsets = [1, 0], sizes = [13, 32], strides = [1, 1]} : vector<14x128xf32> to vector<13x32xf32>
    %c0_56 = arith.constant 0 : index
    %c64_57 = arith.constant 64 : index
    %46 = vector.load %arg7[%c0_56, %c64_57] : memref<32x128xf32, #tpu.memory_space<vmem>>, vector<13x32xf32>
    tpu.vector_store %arg7[%c0_56, %c64_57], %45 {strides = array<i32>} : memref<32x128xf32, #tpu.memory_space<vmem>>, vector<13x32xf32>,
    %47 = vector.extract_strided_slice %40 {offsets = [1, 0], sizes = [13, 32], strides = [1, 1]} : vector<14x128xf32> to vector<13x32xf32>
    %c0_58 = arith.constant 0 : index
    %c96 = arith.constant 96 : index
    %48 = vector.load %arg7[%c0_58, %c96] : memref<32x128xf32, #tpu.memory_space<vmem>>, vector<13x32xf32>
    tpu.vector_store %arg7[%c0_58, %c96], %47 {strides = array<i32>} : memref<32x128xf32, #tpu.memory_space<vmem>>, vector<13x32xf32>,
    %c0_59 = arith.constant 0 : index
    %c0_60 = arith.constant 0 : index
    %49 = vector.load %arg7[%c0_59, %c0_60] : memref<32x128xf32, #tpu.memory_space<vmem>>, vector<13x128xf32>
    %c256 = arith.constant 256 : index
    %c0_61 = arith.constant 0 : index
    %50 = vector.load %arg2[%c256, %c0_61] : memref<1152x128xf32, #tpu.memory_space<vmem>>, vector<128x128xf32>
    %cst_62 = arith.constant dense<0.000000e+00> : vector<13x128xf32>
    %51 = tpu.matmul %49, %50, %cst_62 {dimension_numbers = #tpu.dot_dimension_numbers<[1], [0], [0], [1], [0, 0, 1, 1], [], []>} : vector<13x128xf32>, vector<128x128xf32>, vector<13x128xf32> -> vector<13x128xf32>
    %c2_63 = arith.constant 2 : index
    %c0_64 = arith.constant 0 : index
    %52 = vector.load %arg3[%c2_63, %c0_64] : memref<9x128xf32, #tpu.memory_space<vmem>>, vector<1x128xf32>
    %53 = vector.broadcast %52 : vector<1x128xf32> to vector<13x128xf32>
    %54 = arith.addf %51, %53 : vector<13x128xf32>
    %cst_65 = arith.constant 0.000000e+00 : f32
    %55 = vector.broadcast %cst_65 : f32 to vector<13x128xf32>
    %56 = arith.maximumf %54, %55 : vector<13x128xf32>
    %c0_66 = arith.constant 0 : index
    %c0_67 = arith.constant 0 : index
    %57 = vector.load %arg6[%c0_66, %c0_67] : memref<32x128xf32, #tpu.memory_space<vmem>>, vector<13x128xf32>
    tpu.vector_store %arg6[%c0_66, %c0_67], %56 {strides = array<i32>} : memref<32x128xf32, #tpu.memory_space<vmem>>, vector<13x128xf32>,
    %c0_68 = arith.constant 0 : index
    %c0_69 = arith.constant 0 : index
    %58 = vector.load %arg6[%c0_68, %c0_69] : memref<32x128xf32, #tpu.memory_space<vmem>>, vector<11x32xf32>
    %c0_70 = arith.constant 0 : index
    %c0_71 = arith.constant 0 : index
    %59 = vector.load %arg7[%c0_70, %c0_71] : memref<32x128xf32, #tpu.memory_space<vmem>>, vector<11x32xf32>
    tpu.vector_store %arg7[%c0_70, %c0_71], %58 {strides = array<i32>} : memref<32x128xf32, #tpu.memory_space<vmem>>, vector<11x32xf32>,
    %c1_72 = arith.constant 1 : index
    %c0_73 = arith.constant 0 : index
    %60 = vector.load %arg6[%c1_72, %c0_73] : memref<32x128xf32, #tpu.memory_space<vmem>>, vector<11x32xf32>
    %c0_74 = arith.constant 0 : index
    %c32_75 = arith.constant 32 : index
    %61 = vector.load %arg7[%c0_74, %c32_75] : memref<32x128xf32, #tpu.memory_space<vmem>>, vector<11x32xf32>
    tpu.vector_store %arg7[%c0_74, %c32_75], %60 {strides = array<i32>} : memref<32x128xf32, #tpu.memory_space<vmem>>, vector<11x32xf32>,
    %c2_76 = arith.constant 2 : index
    %c0_77 = arith.constant 0 : index
    %62 = vector.load %arg6[%c2_76, %c0_77] : memref<32x128xf32, #tpu.memory_space<vmem>>, vector<11x32xf32>
    %c0_78 = arith.constant 0 : index
    %c64_79 = arith.constant 64 : index
    %63 = vector.load %arg7[%c0_78, %c64_79] : memref<32x128xf32, #tpu.memory_space<vmem>>, vector<11x32xf32>
    tpu.vector_store %arg7[%c0_78, %c64_79], %62 {strides = array<i32>} : memref<32x128xf32, #tpu.memory_space<vmem>>, vector<11x32xf32>,
    %c0_80 = arith.constant 0 : index
    %c0_81 = arith.constant 0 : index
    %64 = vector.load %arg7[%c0_80, %c0_81] : memref<32x128xf32, #tpu.memory_space<vmem>>, vector<11x128xf32>
    %c384 = arith.constant 384 : index
    %c0_82 = arith.constant 0 : index
    %65 = vector.load %arg2[%c384, %c0_82] : memref<1152x128xf32, #tpu.memory_space<vmem>>, vector<128x128xf32>
    %cst_83 = arith.constant dense<0.000000e+00> : vector<11x128xf32>
    %66 = tpu.matmul %64, %65, %cst_83 {dimension_numbers = #tpu.dot_dimension_numbers<[1], [0], [0], [1], [0, 0, 1, 1], [], []>} : vector<11x128xf32>, vector<128x128xf32>, vector<11x128xf32> -> vector<11x128xf32>
    %c3 = arith.constant 3 : index
    %c0_84 = arith.constant 0 : index
    %67 = vector.load %arg3[%c3, %c0_84] : memref<9x128xf32, #tpu.memory_space<vmem>>, vector<1x128xf32>
    %68 = vector.broadcast %67 : vector<1x128xf32> to vector<11x128xf32>
    %69 = arith.addf %66, %68 : vector<11x128xf32>
    %cst_85 = arith.constant 0.000000e+00 : f32
    %70 = vector.broadcast %cst_85 : f32 to vector<11x128xf32>
    %71 = arith.maximumf %69, %70 : vector<11x128xf32>
    %c1_86 = arith.constant 1 : index
    %c0_87 = arith.constant 0 : index
    %72 = vector.load %arg6[%c1_86, %c0_87] : memref<32x128xf32, #tpu.memory_space<vmem>>, vector<11x128xf32>
    %73 = arith.addf %71, %72 : vector<11x128xf32>
    %c0_88 = arith.constant 0 : index
    %c0_89 = arith.constant 0 : index
    %74 = vector.load %arg5[%c0_88, %c0_89] : memref<32x128xf32, #tpu.memory_space<vmem>>, vector<11x128xf32>
    tpu.vector_store %arg5[%c0_88, %c0_89], %73 {strides = array<i32>} : memref<32x128xf32, #tpu.memory_space<vmem>>, vector<11x128xf32>,
    %c0_90 = arith.constant 0 : index
    %c0_91 = arith.constant 0 : index
    %75 = vector.load %arg5[%c0_90, %c0_91] : memref<32x128xf32, #tpu.memory_space<vmem>>, vector<9x32xf32>
    %c0_92 = arith.constant 0 : index
    %c0_93 = arith.constant 0 : index
    %76 = vector.load %arg7[%c0_92, %c0_93] : memref<32x128xf32, #tpu.memory_space<vmem>>, vector<9x32xf32>
    tpu.vector_store %arg7[%c0_92, %c0_93], %75 {strides = array<i32>} : memref<32x128xf32, #tpu.memory_space<vmem>>, vector<9x32xf32>,
    %c1_94 = arith.constant 1 : index
    %c0_95 = arith.constant 0 : index
    %77 = vector.load %arg5[%c1_94, %c0_95] : memref<32x128xf32, #tpu.memory_space<vmem>>, vector<9x32xf32>
    %c0_96 = arith.constant 0 : index
    %c32_97 = arith.constant 32 : index
    %78 = vector.load %arg7[%c0_96, %c32_97] : memref<32x128xf32, #tpu.memory_space<vmem>>, vector<9x32xf32>
    tpu.vector_store %arg7[%c0_96, %c32_97], %77 {strides = array<i32>} : memref<32x128xf32, #tpu.memory_space<vmem>>, vector<9x32xf32>,
    %c2_98 = arith.constant 2 : index
    %c0_99 = arith.constant 0 : index
    %79 = vector.load %arg5[%c2_98, %c0_99] : memref<32x128xf32, #tpu.memory_space<vmem>>, vector<9x32xf32>
    %c0_100 = arith.constant 0 : index
    %c64_101 = arith.constant 64 : index
    %80 = vector.load %arg7[%c0_100, %c64_101] : memref<32x128xf32, #tpu.memory_space<vmem>>, vector<9x32xf32>
    tpu.vector_store %arg7[%c0_100, %c64_101], %79 {strides = array<i32>} : memref<32x128xf32, #tpu.memory_space<vmem>>, vector<9x32xf32>,
    %c0_102 = arith.constant 0 : index
    %c0_103 = arith.constant 0 : index
    %81 = vector.load %arg7[%c0_102, %c0_103] : memref<32x128xf32, #tpu.memory_space<vmem>>, vector<9x128xf32>
    %c512 = arith.constant 512 : index
    %c0_104 = arith.constant 0 : index
    %82 = vector.load %arg2[%c512, %c0_104] : memref<1152x128xf32, #tpu.memory_space<vmem>>, vector<128x128xf32>
    %cst_105 = arith.constant dense<0.000000e+00> : vector<9x128xf32>
    %83 = tpu.matmul %81, %82, %cst_105 {dimension_numbers = #tpu.dot_dimension_numbers<[1], [0], [0], [1], [0, 0, 1, 1], [], []>} : vector<9x128xf32>, vector<128x128xf32>, vector<9x128xf32> -> vector<9x128xf32>
    %c4_106 = arith.constant 4 : index
    %c0_107 = arith.constant 0 : index
    %84 = vector.load %arg3[%c4_106, %c0_107] : memref<9x128xf32, #tpu.memory_space<vmem>>, vector<1x128xf32>
    %85 = vector.broadcast %84 : vector<1x128xf32> to vector<9x128xf32>
    %86 = arith.addf %83, %85 : vector<9x128xf32>
    %cst_108 = arith.constant 0.000000e+00 : f32
    %87 = vector.broadcast %cst_108 : f32 to vector<9x128xf32>
    %88 = arith.maximumf %86, %87 : vector<9x128xf32>
    %c1_109 = arith.constant 1 : index
    %c0_110 = arith.constant 0 : index
    %89 = vector.load %arg5[%c1_109, %c0_110] : memref<32x128xf32, #tpu.memory_space<vmem>>, vector<9x128xf32>
    %90 = arith.addf %88, %89 : vector<9x128xf32>
    %c0_111 = arith.constant 0 : index
    %c0_112 = arith.constant 0 : index
    %91 = vector.load %arg6[%c0_111, %c0_112] : memref<32x128xf32, #tpu.memory_space<vmem>>, vector<9x128xf32>
    tpu.vector_store %arg6[%c0_111, %c0_112], %90 {strides = array<i32>} : memref<32x128xf32, #tpu.memory_space<vmem>>, vector<9x128xf32>,
    %c0_113 = arith.constant 0 : index
    %c0_114 = arith.constant 0 : index
    %92 = vector.load %arg6[%c0_113, %c0_114] : memref<32x128xf32, #tpu.memory_space<vmem>>, vector<9x128xf32>
    %c640 = arith.constant 640 : index
    %c0_115 = arith.constant 0 : index
    %93 = vector.load %arg2[%c640, %c0_115] : memref<1152x128xf32, #tpu.memory_space<vmem>>, vector<128x128xf32>
    %cst_116 = arith.constant dense<0.000000e+00> : vector<9x128xf32>
    %94 = tpu.matmul %92, %93, %cst_116 {dimension_numbers = #tpu.dot_dimension_numbers<[1], [0], [0], [1], [0, 0, 1, 1], [], []>} : vector<9x128xf32>, vector<128x128xf32>, vector<9x128xf32> -> vector<9x128xf32>
    %c5 = arith.constant 5 : index
    %c0_117 = arith.constant 0 : index
    %95 = vector.load %arg3[%c5, %c0_117] : memref<9x128xf32, #tpu.memory_space<vmem>>, vector<1x128xf32>
    %96 = vector.broadcast %95 : vector<1x128xf32> to vector<9x128xf32>
    %97 = arith.addf %94, %96 : vector<9x128xf32>
    %cst_118 = arith.constant 0.000000e+00 : f32
    %98 = vector.broadcast %cst_118 : f32 to vector<9x128xf32>
    %99 = arith.maximumf %97, %98 : vector<9x128xf32>
    %100 = arith.addf %99, %92 : vector<9x128xf32>
    %c0_119 = arith.constant 0 : index
    %c0_120 = arith.constant 0 : index
    %101 = vector.load %arg5[%c0_119, %c0_120] : memref<32x128xf32, #tpu.memory_space<vmem>>, vector<9x128xf32>
    tpu.vector_store %arg5[%c0_119, %c0_120], %100 {strides = array<i32>} : memref<32x128xf32, #tpu.memory_space<vmem>>, vector<9x128xf32>,
    %c0_121 = arith.constant 0 : index
    %c0_122 = arith.constant 0 : index
    %102 = vector.load %arg5[%c0_121, %c0_122] : memref<32x128xf32, #tpu.memory_space<vmem>>, vector<9x128xf32>
    %c768 = arith.constant 768 : index
    %c0_123 = arith.constant 0 : index
    %103 = vector.load %arg2[%c768, %c0_123] : memref<1152x128xf32, #tpu.memory_space<vmem>>, vector<128x128xf32>
    %cst_124 = arith.constant dense<0.000000e+00> : vector<9x128xf32>
    %104 = tpu.matmul %102, %103, %cst_124 {dimension_numbers = #tpu.dot_dimension_numbers<[1], [0], [0], [1], [0, 0, 1, 1], [], []>} : vector<9x128xf32>, vector<128x128xf32>, vector<9x128xf32> -> vector<9x128xf32>
    %c6 = arith.constant 6 : index
    %c0_125 = arith.constant 0 : index
    %105 = vector.load %arg3[%c6, %c0_125] : memref<9x128xf32, #tpu.memory_space<vmem>>, vector<1x128xf32>
    %106 = vector.broadcast %105 : vector<1x128xf32> to vector<9x128xf32>
    %107 = arith.addf %104, %106 : vector<9x128xf32>
    %cst_126 = arith.constant 0.000000e+00 : f32
    %108 = vector.broadcast %cst_126 : f32 to vector<9x128xf32>
    %109 = arith.maximumf %107, %108 : vector<9x128xf32>
    %110 = arith.addf %109, %102 : vector<9x128xf32>
    %c0_127 = arith.constant 0 : index
    %c0_128 = arith.constant 0 : index
    %111 = vector.load %arg6[%c0_127, %c0_128] : memref<32x128xf32, #tpu.memory_space<vmem>>, vector<9x128xf32>
    tpu.vector_store %arg6[%c0_127, %c0_128], %110 {strides = array<i32>} : memref<32x128xf32, #tpu.memory_space<vmem>>, vector<9x128xf32>,
    %c0_129 = arith.constant 0 : index
    %c0_130 = arith.constant 0 : index
    %112 = vector.load %arg6[%c0_129, %c0_130] : memref<32x128xf32, #tpu.memory_space<vmem>>, vector<9x128xf32>
    %c896 = arith.constant 896 : index
    %c0_131 = arith.constant 0 : index
    %113 = vector.load %arg2[%c896, %c0_131] : memref<1152x128xf32, #tpu.memory_space<vmem>>, vector<128x128xf32>
    %cst_132 = arith.constant dense<0.000000e+00> : vector<9x128xf32>
    %114 = tpu.matmul %112, %113, %cst_132 {dimension_numbers = #tpu.dot_dimension_numbers<[1], [0], [0], [1], [0, 0, 1, 1], [], []>} : vector<9x128xf32>, vector<128x128xf32>, vector<9x128xf32> -> vector<9x128xf32>
    %c7 = arith.constant 7 : index
    %c0_133 = arith.constant 0 : index
    %115 = vector.load %arg3[%c7, %c0_133] : memref<9x128xf32, #tpu.memory_space<vmem>>, vector<1x128xf32>
    %116 = vector.broadcast %115 : vector<1x128xf32> to vector<9x128xf32>
    %117 = arith.addf %114, %116 : vector<9x128xf32>
    %cst_134 = arith.constant 0.000000e+00 : f32
    %118 = vector.broadcast %cst_134 : f32 to vector<9x128xf32>
    %119 = arith.maximumf %117, %118 : vector<9x128xf32>
    %120 = arith.addf %119, %112 : vector<9x128xf32>
    %c0_135 = arith.constant 0 : index
    %c0_136 = arith.constant 0 : index
    %121 = vector.load %arg5[%c0_135, %c0_136] : memref<32x128xf32, #tpu.memory_space<vmem>>, vector<9x128xf32>
    tpu.vector_store %arg5[%c0_135, %c0_136], %120 {strides = array<i32>} : memref<32x128xf32, #tpu.memory_space<vmem>>, vector<9x128xf32>,
    %c0_137 = arith.constant 0 : index
    %c0_138 = arith.constant 0 : index
    %122 = vector.load %arg5[%c0_137, %c0_138] : memref<32x128xf32, #tpu.memory_space<vmem>>, vector<9x128xf32>
    %c1024 = arith.constant 1024 : index
    %c0_139 = arith.constant 0 : index
    %123 = vector.load %arg2[%c1024, %c0_139] : memref<1152x128xf32, #tpu.memory_space<vmem>>, vector<128x128xf32>
    %cst_140 = arith.constant dense<0.000000e+00> : vector<9x128xf32>
    %124 = tpu.matmul %122, %123, %cst_140 {dimension_numbers = #tpu.dot_dimension_numbers<[1], [0], [0], [1], [0, 0, 1, 1], [], []>} : vector<9x128xf32>, vector<128x128xf32>, vector<9x128xf32> -> vector<9x128xf32>
    %c8_141 = arith.constant 8 : index
    %c0_142 = arith.constant 0 : index
    %125 = vector.load %arg3[%c8_141, %c0_142] : memref<9x128xf32, #tpu.memory_space<vmem>>, vector<1x128xf32>
    %126 = vector.broadcast %125 : vector<1x128xf32> to vector<9x128xf32>
    %127 = arith.addf %124, %126 : vector<9x128xf32>
    %cst_143 = arith.constant 0.000000e+00 : f32
    %128 = vector.broadcast %cst_143 : f32 to vector<9x128xf32>
    %129 = arith.maximumf %127, %128 : vector<9x128xf32>
    %130 = arith.addf %129, %122 : vector<9x128xf32>
    %c0_144 = arith.constant 0 : index
    %c0_145 = arith.constant 0 : index
    %c0_146 = arith.constant 0 : index
    %131 = vector.load %arg4[%c0_144, %c0_145, %c0_146] : memref<1x9x128xf32, #tpu.memory_space<vmem>>, vector<1x9x128xf32>
    %132 = vector.shape_cast %131 : vector<1x9x128xf32> to vector<9x128xf32>
    %133 = vector.shape_cast %130 : vector<9x128xf32> to vector<1x9x128xf32>
    tpu.vector_store %arg4[%c0_144, %c0_145, %c0_146], %133 {strides = array<i32>} : memref<1x9x128xf32, #tpu.memory_space<vmem>>, vector<1x9x128xf32>,
    return
  }
  func.func @transform_0(%arg0: i32) -> (i32, i32, i32) {
    %c0_i32 = arith.constant 0 : i32
    %c0_i32_0 = arith.constant 0 : i32
    %c0_i32_1 = arith.constant 0 : i32
    return %arg0, %c0_i32, %c0_i32_0 : i32, i32, i32
  }
  func.func @transform_1(%arg0: i32) -> (i32, i32) {
    %c0_i32 = arith.constant 0 : i32
    %c0_i32_0 = arith.constant 0 : i32
    %c0_i32_1 = arith.constant 0 : i32
    return %c0_i32, %c0_i32_0 : i32, i32
  }
  func.func @transform_2(%arg0: i32) -> (i32, i32) {
    %c0_i32 = arith.constant 0 : i32
    %c0_i32_0 = arith.constant 0 : i32
    %c0_i32_1 = arith.constant 0 : i32
    return %c0_i32, %c0_i32_0 : i32, i32
  }
  func.func @transform_3(%arg0: i32) -> (i32, i32, i32) {
    %c0_i32 = arith.constant 0 : i32
    %c0_i32_0 = arith.constant 0 : i32
    %c0_i32_1 = arith.constant 0 : i32
    return %arg0, %c0_i32, %c0_i32_0 : i32, i32, i32
  }
}

</mosaic_0001>

<bundles_post_ra>
// kernel: tpu_custom_call.1
= control target key start
LH: loop header
LB: loop body
LE: loop exit
PB: predicated region body
PF: predicated region fallthrough
CT: control target
= control target key end

     0   :  { %8 = vsyncpa [#allocation6], 0  ;;  %s2367_s12 = smov 0   ;;  %s2517_s0 = inlined_call_operand.vmem [shape: f32[2,32,4], index: 0, kind: input, shape index: {}]   ;;  %s2518_s1 = inlined_call_operand.hbm [shape: f32[1152,128], index: 1, kind: input, shape index: {}]   ;;  %s2519_s2 = inlined_call_operand.vmem [shape: f32[9,128], index: 2, kind: input, shape index: {}]   ;;  %s2520_s3 = inlined_call_operand.vmem [shape: f32[2,9,128], index: 3, kind: output, shape index: {}]  }
   0x1 LB: > { %s2373_s13 = sadd.s32 4294967295, %s2336_s12   ;;  %p1474_p0 = scmp.ge.s32.totalorder %s2336_s12, 1  ;;  %s2336_s12 = sphi %s2367_s12, %s14_s12  }
   0x2   : > { %p113_p1 = scmp.lt.s32.totalorder %s2336_s12, 3  ;;  %s2338_s14 = smov [#allocation5]  }
   0x3   : > { %s125_s15 = sshll.u32 %s2338_s14, 4  ;;  %p2521_p3 = scmp.eq.s32.totalorder %s2373_s13, 0  ;;  %s126_s15 = int_to_ptr.vmem [resolvable:$true] %s125_s15 }
   0x4   : > { %p2377_p2 = pnand %p1474_p0, %p113_p1  ;;  %s2298_s20 = scalar_lea.hbm %s2518_s1, 18432 }
   0x5   : > { %p2299_p6 = scmp.ne.s32.totalorder %s2518_s1, %s2298_s20  ;;  %p2305_p10 = scmp.lt.u32.totalorder %s2298_s20, %s2518_s1 }
   0x6   : > { %s2523_s16 = scalar_select %p2377_p2, 1, 0 }
   0x7   : > { %p2275_p4 = pneg %p2377_p2 }
   0x9   : > { %p2386_p5 = pnand %p2521_p3, %p2275_p4 }
   0xb   : > { %p2300_p7 = pneg %p2386_p5 }
   0xd   : > { %p2301_p8 = pnand %p2300_p7, %p2299_p6 }
   0xf   : > { %p2302_p9 = pneg %p2301_p8 }
  0x11   : > { %p2307_p11 = pnand %p2305_p10, %p2302_p9 }
  0x13   : > { %2310 = shalt.err (!%p2307_p11)
}
  0x14   : > { %s2311_s25 = scalar_lea.vmem %s126_s15, 18432  ;;  %p2319_p1 = scmp.lt.s32.totalorder %s126_s15, %s126_s15 }
  0x15   : > { %p2312_p12 = scmp.ne.s32.totalorder %s126_s15, %s2311_s25  ;;  %p2320_p4 = scmp.lt.s32.totalorder %s2311_s25, %s2311_s25 }
  0x17   : > { %p2314_p13 = pnand %p2312_p12, %p2300_p7  ;;  %p2321_p3 = por %p2320_p4, %p2319_p1 }
  0x19   : > { %p2315_p0 = pneg %p2314_p13 }
  0x1b   : > { %p2322_p2 = pnand %p2321_p3, %p2315_p0 }
  0x1d   : > { %2325 = shalt.err (!%p2322_p2)
}
  0x1e   : > { %s2339_s26 = smov 128   ;;  %s2340_s27 = smov 8  }
  0x1f   : > { %2278 = dma.hbm_to_vmem [thread:$0]  (!%p2386_p5), %s2518_s1, 18432, %s126_s15, [#allocation6], %s2339_s26, %s2339_s26, %s2340_s27  }
  0x20   : > { %p2525_p6 = scmp.ne.s32.totalorder %s2523_s16, 0 }
  0x21   : > { %p2526_p8 = scmp.eq.s32.totalorder (!%p2525_p6), %s2373_s13, 0 }
  0x22   : > { %152 = sbr.rel (%p2525_p6) target bundleno = 2743 (0xab7), region = 32 }
  0x29   : > { %2331 = dma.done.wait (%p2526_p8), [#allocation6], 18432   ;;  %p2527_p7 = pmov %p2526_p8 }
  0x2a   : > { %p176_p2 = scmp.lt.s32.totalorder %s2373_s13, 1  ;;  %v2341_v0 = vmov 0.0   ;;  %vm194_vm0 = vcmask 31744   ;;  %v268_v5 = vld [vmem:[#allocation5] sm:$0xff]  ;;  %v269_v6 = vld [vmem:[#allocation5 + $0x8] sm:$0xff]  ;;  %v270_v8 = vld [vmem:[#allocation5 + $0x10] sm:$0xff] }
  0x2b   : > { %2333 = vsyncadd (%p2527_p7), [#allocation6], 4294948864  ;;  %186 = vst [vmem:[#allocation2] sm:$0xff] %v2341_v0  ;;  %v1983_v7 = vpack.c.bf16 %v269_v6, %v268_v5  ;;  %v271_v9 = vld [vmem:[#allocation5 + $0x18] sm:$0xff]  ;;  %v272_v11 = vld [vmem:[#allocation5 + $0x20] sm:$0xff]  ;;  %s2342_s7 = smov 4  }
  0x2c   : > { %187 = vst [vmem:[#allocation2 + $0x8] sm:$0xff] %v2341_v0  ;;  %188 = vst [vmem:[#allocation2 + $0x10] sm:$0xff] %v2341_v0  ;;  %s2529_s13 = smov (!%p176_p2, %s2373_s13), 1  ;;  %v1987_v10 = vpack.c.bf16 %v271_v9, %v270_v8  ;;  %v273_v12 = vld [vmem:[#allocation5 + $0x28] sm:$0xff]  ;;  %v274_v14 = vld [vmem:[#allocation5 + $0x30] sm:$0xff]  ;;  %s2343_s8 = smov 8  }
  0x2d   : > { %189 = vst [vmem:[#allocation2 + $0x18] sm:$0xff] %v2341_v0  ;;  %199 = vst [vmem:[#allocation4] sm:$0xff] %v2341_v0  ;;  %s1494_s30 = sshll.u32 %s2529_s13, 5  ;;  %1984 = vmatprep.subr.bf16.mxu0 %v1983_v7  ;;  %v1991_v13 = vpack.c.bf16 %v273_v12, %v272_v11  ;;  %v275_v17 = vld [vmem:[#allocation5 + $0x38] sm:$0xff]  ;;  %vm210_vm1 = vcmask 29696   ;;  %v276_v25 = vld [vmem:[#allocation5 + $0x40] sm:$0xff] }
  0x2e   : > { %200 = vst [vmem:[#allocation4 + $0x8] sm:$0xff] %v2341_v0  ;;  %201 = vst [vmem:[#allocation4 + $0x10] sm:$0xff] %v2341_v0  ;;  %s180_s6 = scalar_lea.vmem %s2517_s0, %s1494_s30  ;;  %1986 = vmatpush3.bf16.msra.mxu0 %v1983_v7  ;;  %v1995_v21 = vpack.c.bf16 %v275_v17, %v274_v14  ;;  %v277_v26 = vld [vmem:[#allocation5 + $0x48] sm:$0xff]  ;;  %v278_v30 = vld [vmem:[#allocation5 + $0x50] sm:$0xff]  ;;  %vm232_vm2 = vcmask 64544   ;;  %vm258_vm3 = vcmask 97344  }
  0x2f   : > { %202 = vst [vmem:[#allocation4 + $0x18] sm:$0xff] %v2341_v0  ;;  %v190_v1 = vld [vmem:[%s180_s6] sm:$0xff]  ;;  %v191_v2 = vld [vmem:[%s180_s6 + $0x8] sm:$0xff]  ;;  %v192_v3 = vld [vmem:[%s180_s6 + $0x10] sm:$0xff]  ;;  %1988 = vmatprep.subr.bf16.mxu0 %v1987_v10  ;;  %v1999_v29 = vpack.c.bf16 %v277_v26, %v276_v25  ;;  %vm236_vm4 = vcmask 62496   ;;  %vm262_vm5 = vcmask 95296  }
  0x30   : > { %195 = vst.msk [vmem:[#allocation2] sm:$0xff] %vm194_vm0, %v190_v1  ;;  %196 = vst.msk [vmem:[#allocation2 + $0x8] sm:$0xff] %vm194_vm0, %v191_v2  ;;  %v193_v4 = vld [vmem:[%s180_s6 + $0x18] sm:$0xff]  ;;  %v280_v35 = vld [vmem:[#allocation5 + $0x60] sm:$0xff]  ;;  %vm386_vm6 = vcmask 261120   ;;  %s2344_s11 = smov 32  }
  0x31   : > { %197 = vst.msk [vmem:[#allocation2 + $0x10] sm:$0xff] %vm194_vm0, %v192_v3  ;;  %198 = vst.msk [vmem:[#allocation2 + $0x18] sm:$0xff] %vm194_vm0, %v193_v4  ;;  %v279_v31 = vld [vmem:[#allocation5 + $0x58] sm:$0xff]  ;;  %v281_v36 = vld [vmem:[#allocation5 + $0x68] sm:$0xff]  ;;  %s2345_s14 = smov 64   ;;  %vm390_vm7 = vcmask 257024  }
  0x32   : > { %1990 = vmatpush3.bf16.msra.mxu0 %v1987_v10  ;;  %v2003_v34 = vpack.c.bf16 %v279_v31, %v278_v30  ;;  %v2007_v37 = vpack.c.bf16 %v281_v36, %v280_v35  ;;  %v282_v38 = vld [vmem:[#allocation5 + $0x70] sm:$0xff]  ;;  %v283_v39 = vld [vmem:[#allocation5 + $0x78] sm:$0xff]  ;;  %v448_v53 = vld [vmem:[#allocation5 + $0x80] sm:$0xff]  ;;  %vm412_vm8 = vcmask 523520   ;;  %vm438_vm9 = vcmask 785920   ;;  %s2346_s17 = smov 96  }
  0x33   : > { %1992 = vmatprep.subr.bf16.mxu0 %v1991_v13  ;;  %v2011_v40 = vpack.c.bf16 %v283_v39, %v282_v38  ;;  %v449_v54 = vld [vmem:[#allocation5 + $0x88] sm:$0xff]  ;;  %v450_v55 = vld [vmem:[#allocation5 + $0x90] sm:$0xff]  ;;  %v451_v57 = vld [vmem:[#allocation5 + $0x98] sm:$0xff]  ;;  %vm416_vm10 = vcmask 519424   ;;  %vm442_vm11 = vcmask 781824   ;;  %vm578_vm12 = vcmask 258048  }
  0x34   : > { %v2015_v56 = vpack.c.bf16 %v449_v54, %v448_v53  ;;  %v2019_v58 = vpack.c.bf16 %v451_v57, %v450_v55  ;;  %v452_v59 = vld [vmem:[#allocation5 + $0xa0] sm:$0xff]  ;;  %v453_v60 = vld [vmem:[#allocation5 + $0xa8] sm:$0xff]  ;;  %v454_v2 = vld [vmem:[#allocation5 + $0xb0] sm:$0xff]  ;;  %vm589_vm13 = vcmask 520448   ;;  %vm599_vm14 = vcmask 785921   ;;  %s1495_s5 = sshll.u32 %s2529_s13, 4 }
  0x35   : > { %v2023_v61 = vpack.c.bf16 %v453_v60, %v452_v59  ;;  %v1483_v62 = vld [vmem:[%s2519_s2] ss:$0 sm:$0xff]  ;;  %v455_v3 = vld [vmem:[#allocation5 + $0xb8] sm:$0xff]  ;;  %v457_v9 = vld [vmem:[#allocation5 + $0xc8] sm:$0xff]  ;;  %vm601_vm15 = vcmask 783872  }
  0x36   : > { %1994 = vmatpush3.bf16.msra.mxu0 %v1991_v13  ;;  %2016 = vmatprep.subr.bf16.mxu1 %v2015_v56  ;;  %v2027_v5 = vpack.c.bf16 %v455_v3, %v454_v2  ;;  %v456_v8 = vld [vmem:[#allocation5 + $0xc0] sm:$0xff]  ;;  %v462_v25 = vld [vmem:[#allocation5 + $0xf0] sm:$0xff]  ;;  %v463_v26 = vld [vmem:[#allocation5 + $0xf8] sm:$0xff] }
  0x37   : > { %v212_v15 = vld [vmem:[#allocation2 + $0x1] sm:$0xff]  ;;  %1996 = vmatprep.subr.bf16.mxu0 %v1995_v21  ;;  %2018 = vmatpush3.bf16.msra.mxu1 %v2015_v56  ;;  %v2031_v10 = vpack.c.bf16 %v457_v9, %v456_v8 }
  0x38   : > { %v238_v16 = vld [vmem:[#allocation2 + $0x2] sm:$0xff]  ;;  %220 = vrot.lane.b32.xlu0 %v212_v15, %s2342_s7  ;;  %v239_v19 = vld [vmem:[#allocation2 + $0xa] sm:$0xff]  ;;  %v206_v24 = vld [vmem:[#allocation2 + $0x18] sm:$0x3f]  ;;  %2020 = vmatprep.subr.bf16.mxu1 %v2019_v58 }
  0x39   : > { %246 = vrot.lane.b32.xlu1 %v238_v16, %s2343_s8  ;;  %v213_v18 = vld [vmem:[#allocation2 + $0x9] sm:$0xff]  ;;  %v203_v20 = vld [vmem:[#allocation2] sm:$0xff]  ;;  %211 = vst.msk [vmem:[#allocation4 + $0x18] sm:$0x3f] %vm210_vm1, %v206_v24  ;;  %v214_v27 = vld [vmem:[#allocation2 + $0x11] sm:$0xff]  ;;  %vm611_vm1 = vcmask 1046272  }
  0x3a   : > { %207 = vst.msk [vmem:[#allocation4] sm:$0xff] %vm194_vm0, %v203_v20  ;;  %v204_v22 = vld [vmem:[#allocation2 + $0x8] sm:$0xff]  ;;  %v205_v23 = vld [vmem:[#allocation2 + $0x10] sm:$0xff]  ;;  %v215_v28 = vld [vmem:[#allocation2 + $0x19] sm:$0x3f]  ;;  %1998 = vmatpush3.bf16.msra.mxu0 %v1995_v21 }
  0x3b   : > { %208 = vst.msk [vmem:[#allocation4 + $0x8] sm:$0xff] %vm194_vm0, %v204_v22  ;;  %209 = vst.msk [vmem:[#allocation4 + $0x10] sm:$0xff] %vm194_vm0, %v205_v23  ;;  %v240_v32 = vld [vmem:[#allocation2 + $0x12] sm:$0xff]  ;;  %v241_v33 = vld [vmem:[#allocation2 + $0x1a] sm:$0x3f]  ;;  %2000 = vmatprep.subr.bf16.mxu0 %v1999_v29  ;;  %2022 = vmatpush3.bf16.msra.mxu1 %v2019_v58  ;;  %vm609_vm0 = vcmask 1048321  }
  0x3c   : > { %222 = vrot.lane.b32.xlu0 %v213_v18, %s2342_s7  ;;  %2024 = vmatprep.subr.bf16.mxu1 %v2023_v61  ;;  %v458_v15 = vld [vmem:[#allocation5 + $0xd0] sm:$0xff]  ;;  %v459_v16 = vld [vmem:[#allocation5 + $0xd8] sm:$0xff]  ;;  %v460_v21 = vld [vmem:[#allocation5 + $0xe0] sm:$0xff] }
  0x3d   : > { %248 = vrot.lane.b32.xlu1 %v239_v19, %s2343_s8  ;;  %v2035_v18 = vpack.c.bf16 %v459_v16, %v458_v15  ;;  %v461_v22 = vld [vmem:[#allocation5 + $0xe8] sm:$0xff]  ;;  %v619_v53 = vld [vmem:[#allocation5 + $0x120] sm:$0xff]  ;;  %v625_v16 = vld [vmem:[#allocation5 + $0x150] sm:$0xff] }
  0x3e   : > { %2002 = vmatpush3.bf16.msra.mxu0 %v1999_v29  ;;  %v2039_v23 = vpack.c.bf16 %v461_v22, %v460_v21  ;;  %v620_v54 = vld [vmem:[#allocation5 + $0x128] sm:$0xff]  ;;  %v1484_v56 = vld [vmem:[%s2519_s2 + $0x1] ss:$0 sm:$0xff] }
  0x3f   : > { %2004 = vmatprep.subr.bf16.mxu0 %v2003_v34  ;;  %2026 = vmatpush3.bf16.msra.mxu1 %v2023_v61  ;;  %v2055_v55 = vpack.c.bf16 %v620_v54, %v619_v53  ;;  %v623_v9 = vld [vmem:[#allocation5 + $0x140] sm:$0xff]  ;;  %v628_v22 = vld [vmem:[#allocation5 + $0x168] sm:$0xff] }
  0x40   : > { %224 = vrot.lane.b32.xlu0 %v214_v27, %s2342_s7  ;;  %2028 = vmatprep.subr.bf16.mxu1 %v2027_v5  ;;  %v2043_v27 = vpack.c.bf16 %v463_v26, %v462_v25  ;;  %v627_v21 = vld [vmem:[#allocation5 + $0x160] sm:$0xff] }
  0x41   : > { %226 = vrot.lane.b32.xlu1 %v215_v28, %s2342_s7  ;;  %v2071_v25 = vpack.c.bf16 %v628_v22, %v627_v21  ;;  %v889_v21 = vld [vmem:[#allocation5 + $0x220] sm:$0xff]  ;;  %v890_v22 = vld [vmem:[#allocation5 + $0x228] sm:$0xff] }
  0x42   : > { %2006 = vmatpush3.bf16.msra.mxu0 %v2003_v34 }
  0x43   : > { %2008 = vmatprep.subr.bf16.mxu0 %v2007_v37  ;;  %2030 = vmatpush3.bf16.msra.mxu1 %v2027_v5 }
  0x44   : > { %250 = vrot.lane.b32.xlu0 %v240_v32, %s2343_s8  ;;  %2032 = vmatprep.subr.bf16.mxu1 %v2031_v10 }
  0x45   : > { %252 = vrot.lane.b32.xlu1 %v241_v33, %s2343_s8  ;;  %s185_s8 = scalar_lea.vmem %s2520_s3, %s1495_s5 }
  0x46   : > { %2010 = vmatpush3.bf16.msra.mxu0 %v2007_v37 }
  0x47   : > { %2012 = vmatprep.subr.bf16.mxu0 %v2011_v40  ;;  %2034 = vmatpush3.bf16.msra.mxu1 %v2031_v10  ;;  %v624_v10 = vld [vmem:[#allocation5 + $0x148] sm:$0xff] }
  0x48   : > { %2036 = vmatprep.subr.bf16.mxu1 %v2035_v18 }
  0x4a   : > { %2014 = vmatpush3.bf16.msra.mxu0 %v2011_v40 }
  0x4b   : > { %2038 = vmatpush3.bf16.msra.mxu1 %v2035_v18 }
  0x4c   : > { %2040 = vmatprep.subr.bf16.mxu1 %v2039_v23 }
  0x4f   : > { %2042 = vmatpush3.bf16.msra.mxu1 %v2039_v23  ;;  %v629_v23 = vld [vmem:[#allocation5 + $0x170] sm:$0xff] }
  0x50   : > { %2044 = vmatprep.subr.bf16.mxu1 %v2043_v27 }
  0x53   : > { %2046 = vmatpush3.bf16.msra.mxu1 %v2043_v27 }
  0xaa   : > { %v221_v41 = vpop.permute.xlu0 %220 }
  0xab   : > { %v247_v42 = vpop.permute.xlu1 %246  ;;  %233 = vst.msk [vmem:[#allocation4] sm:$0xff] %vm232_vm2, %v221_v41 }
  0xac   : > { %259 = vst.msk [vmem:[#allocation4] sm:$0xff] %vm258_vm3, %v247_v42 }
  0xae   : > { %v223_v43 = vpop.permute.xlu0 %222 }
  0xaf   : > { %v249_v44 = vpop.permute.xlu1 %248  ;;  %234 = vst.msk [vmem:[#allocation4 + $0x8] sm:$0xff] %vm232_vm2, %v223_v43 }
  0xb0   : > { %260 = vst.msk [vmem:[#allocation4 + $0x8] sm:$0xff] %vm258_vm3, %v249_v44 }
  0xb2   : > { %v225_v45 = vpop.permute.xlu0 %224 }
  0xb3   : > { %v227_v46 = vpop.permute.xlu1 %226  ;;  %235 = vst.msk [vmem:[#allocation4 + $0x10] sm:$0xff] %vm232_vm2, %v225_v45  ;;  %v264_v47 = vld [vmem:[#allocation4] sm:$0xff]  ;;  %vm718_vm2 = vcmask 256000  }
  0xb4   : > { %237 = vst.msk [vmem:[#allocation4 + $0x18] sm:$0x3f] %vm236_vm4, %v227_v46  ;;  %1694 = vmatprep.mubr.f32.mxu0 %v264_v47  ;;  %v615_v47 = vld [vmem:[#allocation5 + $0x100] sm:$0xff]  ;;  %vm744_vm4 = vcmask 780800  }
  0xb6   : > { %v251_v48 = vpop.permute.xlu0 %250 }
  0xb7   : > { %v253_v49 = vpop.permute.xlu1 %252  ;;  %261 = vst.msk [vmem:[#allocation4 + $0x10] sm:$0xff] %vm258_vm3, %v251_v48  ;;  %v265_v50 = vld [vmem:[#allocation4 + $0x8] sm:$0xff]  ;;  %vm731_vm3 = vcmask 518400  }
  0xb8   : > { %263 = vst.msk [vmem:[#allocation4 + $0x18] sm:$0x3f] %vm262_vm5, %v253_v49  ;;  %1695 = vmatmul.mubr.f32.vlgmr.msra.gmra.mrb[0].mxu0 %v265_v50  ;;  %v616_v48 = vld [vmem:[#allocation5 + $0x108] sm:$0xff]  ;;  %v617_v49 = vld [vmem:[#allocation5 + $0x110] sm:$0xff]  ;;  %vm855_vm5 = vcmask 253952  }
  0xb9   : > { %v2047_v50 = vpack.c.bf16 %v616_v48, %v615_v47  ;;  %v755_v47 = vld [vmem:[#allocation5 + $0x1b8] sm:$0xff] }
  0xbb   : > { %2048 = vmatprep.subr.bf16.mxu0 %v2047_v50 }
  0xbc   : > { %2050 = vmatpush3.bf16.msra.mxu0 %v2047_v50  ;;  %v757_v50 = vld [vmem:[#allocation5 + $0x1c8] sm:$0xff] }
  0xbe   : > { %v266_v51 = vld [vmem:[#allocation4 + $0x10] sm:$0xff] }
  0xbf   : > { %v267_v52 = vld [vmem:[#allocation4 + $0x18] sm:$0x3f]  ;;  %1697 = vmatprep.mubr.f32.mxu0 %v266_v51 }
  0xc0   : > { %1698 = vmatmul.mubr.f32.gmra.mrb[2].mxu0 %v267_v52  ;;  %v618_v51 = vld [vmem:[#allocation5 + $0x118] sm:$0xff] }
  0xc1   : > { %v2051_v52 = vpack.c.bf16 %v618_v51, %v617_v49  ;;  %v756_v49 = vld [vmem:[#allocation5 + $0x1c0] sm:$0xff] }
  0xc2   : > { %v2095_v51 = vpack.c.bf16 %v757_v50, %v756_v49 }
  0xc3   : > { %2052 = vmatprep.subr.bf16.mxu0 %v2051_v52 }
  0xc4   : > { %2054 = vmatpush3.bf16.msra.mxu0 %v2051_v52  ;;  %v1485_v52 = vld [vmem:[%s2519_s2 + $0x2] ss:$0 sm:$0xff] }
  0xc5   : > { %2056 = vmatprep.subr.bf16.mxu0 %v2055_v55 }
  0xc8   : > { %2058 = vmatpush3.bf16.msra.mxu0 %v2055_v55 }
 0x18b   : > { %v1696_v63 = vpop.f32.mrb[0].mxu0 }
 0x18c   : > { %v361_v0 = vadd.f32 %v1696_v63, %v1483_v62  ;;  %v355_v1 = vpop.f32.mrb[1].mxu0  ;;  %v622_v63 = vld [vmem:[#allocation5 + $0x138] sm:$0xff] }
 0x18d   : > { %v356_v4 = vadd.f32 %v1483_v62, %v355_v1 }
 0x18e   : > { %v375_v6 = vmax.f32 %v361_v0, 0.0 }
 0x18f   : > { %v374_v7 = vmax.f32 %v356_v4, 0.0 }
 0x190   : > { %379 = vst [vmem:[#allocation3 + $0x8] sm:$0xff] %v375_v6  ;;  %388 = vst.msk [vmem:[#allocation4 + $0x8] sm:$0xff] %vm386_vm6, %v375_v6 }
 0x191   : > { %378 = vst [vmem:[#allocation3] sm:$0xff] %v374_v7  ;;  %387 = vst.msk [vmem:[#allocation4] sm:$0xff] %vm386_vm6, %v374_v7 }
 0x193   : > { %v1699_v11 = vpop.f32.mrb[2].mxu0 }
 0x194   : > { %v371_v12 = vadd.f32 %v1699_v11, %v1483_v62  ;;  %v365_v13 = vpop.f32.mrb[3].mxu0 }
 0x195   : > { %v366_v14 = vadd.f32 %v1483_v62, %v365_v13  ;;  %v621_v62 = vld [vmem:[#allocation5 + $0x130] sm:$0xff]  ;;  %v2063_v13 = vpack.c.bf16 %v624_v10, %v623_v9 }
 0x196   : > { %v377_v17 = vmax.f32 %v371_v12, 0.0  ;;  %v2059_v2 = vpack.c.bf16 %v622_v63, %v621_v62  ;;  %v760_v62 = vld [vmem:[#allocation5 + $0x1e0] sm:$0xff]  ;;  %v761_v63 = vld [vmem:[#allocation5 + $0x1e8] sm:$0xff] }
 0x197   : > { %v376_v19 = vmax.f32 %v366_v14, 0.0 }
 0x198   : > { %381 = vst [vmem:[#allocation3 + $0x18] sm:$0x3f] %v377_v17  ;;  %v2439_v20 = vld [vmem:[#allocation3 + $0x1] sm:$0xff]  ;;  %2060 = vmatprep.subr.bf16.mxu0 %v2059_v2  ;;  %v626_v17 = vld [vmem:[#allocation5 + $0x158] sm:$0xff] }
 0x199   : > { %380 = vst [vmem:[#allocation3 + $0x10] sm:$0xff] %v376_v19  ;;  %400 = vrot.lane.b32.xlu0 %v2439_v20, %s2344_s11  ;;  %389 = vst.msk [vmem:[#allocation4 + $0x10] sm:$0xff] %vm386_vm6, %v376_v19  ;;  %v418_v24 = vld [vmem:[#allocation3 + $0x2] sm:$0xff]  ;;  %2062 = vmatpush3.bf16.msra.mxu0 %v2059_v2  ;;  %v2067_v18 = vpack.c.bf16 %v626_v17, %v625_v16  ;;  %v763_v2 = vld [vmem:[#allocation5 + $0x1f8] sm:$0xff] }
 0x19a   : > { %2064 = vmatprep.subr.bf16.mxu0 %v2063_v13  ;;  %v886_v16 = vld [vmem:[#allocation5 + $0x208] sm:$0xff]  ;;  %v887_v17 = vld [vmem:[#allocation5 + $0x210] sm:$0xff] }
 0x19d   : > { %426 = vrot.lane.b32.xlu0 %v418_v24, %s2345_s14  ;;  %2066 = vmatpush3.bf16.msra.mxu0 %v2063_v13  ;;  %v630_v24 = vld [vmem:[#allocation5 + $0x178] sm:$0xff] }
 0x19e   : > { %2068 = vmatprep.subr.bf16.mxu0 %v2067_v18  ;;  %v2075_v26 = vpack.c.bf16 %v630_v24, %v629_v23  ;;  %v2119_v23 = vpack.c.bf16 %v890_v22, %v889_v21  ;;  %v891_v24 = vld [vmem:[#allocation5 + $0x230] sm:$0xff]  ;;  %v1096_v21 = vld [vmem:[#allocation5 + $0x308] sm:$0xff] }
 0x19f   : > { %v395_v28 = vld [vmem:[#allocation3 + $0x19] sm:$0xf]  ;;  %v1097_v22 = vld [vmem:[#allocation5 + $0x310] sm:$0xff] }
 0x1a0   : > { %v385_v29 = vld [vmem:[#allocation3 + $0x18] sm:$0xf]  ;;  %406 = vrot.lane.b32.xlu1 %v395_v28, %s2344_s11  ;;  %v393_v31 = vld [vmem:[#allocation3 + $0x9] sm:$0xff] }
 0x1a1   : > { %v2446_v30 = vld [vmem:[#allocation3 + $0x11] sm:$0xff]  ;;  %391 = vst.msk [vmem:[#allocation4 + $0x18] sm:$0xf] %vm390_vm7, %v385_v29  ;;  %v421_v34 = vld [vmem:[#allocation3 + $0x1a] sm:$0xf]  ;;  %2070 = vmatpush3.bf16.msra.mxu0 %v2067_v18  ;;  %vm881_vm7 = vcmask 778752  }
 0x1a2   : > { %404 = vrot.lane.b32.xlu0 %v2446_v30, %s2344_s11  ;;  %v420_v32 = vld [vmem:[#allocation3 + $0x12] sm:$0xff]  ;;  %v419_v33 = vld [vmem:[#allocation3 + $0xa] sm:$0xff]  ;;  %2072 = vmatprep.subr.bf16.mxu0 %v2071_v25 }
 0x1a3   : > { %v561_v11 = vld [vmem:[#allocation3 + $0x19] sm:$0xf] }
 0x1a4   : > { %402 = vrot.lane.b32.xlu1 %v393_v31, %s2344_s11 }
 0x1a5   : > { %2074 = vmatpush3.bf16.msra.mxu0 %v2071_v25  ;;  %v892_v25 = vld [vmem:[#allocation5 + $0x238] sm:$0xff] }
 0x1a6   : > { %430 = vrot.lane.b32.xlu0 %v420_v32, %s2345_s14  ;;  %2076 = vmatprep.subr.bf16.mxu0 %v2075_v26 }
 0x1a8   : > { %428 = vrot.lane.b32.xlu1 %v419_v33, %s2345_s14 }
 0x1a9   : > { %2078 = vmatpush3.bf16.msra.mxu0 %v2075_v26  ;;  %v2123_v26 = vpack.c.bf16 %v892_v25, %v891_v24  ;;  %v1098_v24 = vld [vmem:[#allocation5 + $0x318] sm:$0xff] }
 0x1aa   : > { %v2179_v25 = vpack.c.bf16 %v1098_v24, %v1097_v22  ;;  %v1213_v22 = vld [vmem:[#allocation5 + $0x3f0] sm:$0xff] }
 0x1ac   : > { %432 = vrot.lane.b32.xlu1 %v421_v34, %s2345_s14 }
 0x20b   : > { %v401_v35 = vpop.permute.xlu0 %400 }
 0x20c   : > { %413 = vst.msk [vmem:[#allocation4] sm:$0xff] %vm412_vm8, %v401_v35 }
 0x20f   : > { %v427_v36 = vpop.permute.xlu0 %426 }
 0x210   : > { %439 = vst.msk [vmem:[#allocation4] sm:$0xff] %vm438_vm9, %v427_v36 }
 0x212   : > { %v407_v37 = vpop.permute.xlu1 %406 }
 0x213   : > { %417 = vst.msk [vmem:[#allocation4 + $0x18] sm:$0xf] %vm416_vm10, %v407_v37  ;;  %v748_v37 = vld [vmem:[#allocation5 + $0x180] sm:$0xff] }
 0x214   : > { %v405_v38 = vpop.permute.xlu0 %404 }
 0x215   : > { %415 = vst.msk [vmem:[#allocation4 + $0x10] sm:$0xff] %vm412_vm8, %v405_v38  ;;  %v749_v38 = vld [vmem:[#allocation5 + $0x188] sm:$0xff] }
 0x216   : > { %v403_v39 = vpop.permute.xlu1 %402 }
 0x217   : > { %414 = vst.msk [vmem:[#allocation4 + $0x8] sm:$0xff] %vm412_vm8, %v403_v39  ;;  %v444_v41 = vld [vmem:[#allocation4] sm:$0xff]  ;;  %v750_v39 = vld [vmem:[#allocation5 + $0x190] sm:$0xff] }
 0x218   : > { %v431_v40 = vpop.permute.xlu0 %430  ;;  %1732 = vmatprep.mubr.f32.mxu1 %v444_v41  ;;  %v751_v41 = vld [vmem:[#allocation5 + $0x198] sm:$0xff] }
 0x219   : > { %441 = vst.msk [vmem:[#allocation4 + $0x10] sm:$0xff] %vm438_vm9, %v431_v40  ;;  %v2079_v40 = vpack.c.bf16 %v749_v38, %v748_v37  ;;  %v896_v37 = vld [vmem:[#allocation5 + $0x258] sm:$0xff] }
 0x21a   : > { %v429_v42 = vpop.permute.xlu1 %428 }
 0x21b   : > { %440 = vst.msk [vmem:[#allocation4 + $0x8] sm:$0xff] %vm438_vm9, %v429_v42  ;;  %v2083_v42 = vpack.c.bf16 %v751_v41, %v750_v39  ;;  %2080 = vmatprep.subr.bf16.mxu1 %v2079_v40 }
 0x21e   : > { %v433_v43 = vpop.permute.xlu1 %432 }
 0x21f   : > { %443 = vst.msk [vmem:[#allocation4 + $0x18] sm:$0xf] %vm442_vm11, %v433_v43  ;;  %v752_v43 = vld [vmem:[#allocation5 + $0x1a0] sm:$0xff] }
 0x220   : > { %v446_v45 = vld [vmem:[#allocation4 + $0x10] sm:$0xff] }
 0x222   : > { %v445_v44 = vld [vmem:[#allocation4 + $0x8] sm:$0xff] }
 0x223   : > { %1733 = vmatmul.mubr.f32.vlgmr.msra.gmra.mrb[0].mxu1 %v445_v44  ;;  %v753_v44 = vld [vmem:[#allocation5 + $0x1a8] sm:$0xff] }
 0x224   : > { %1735 = vmatprep.mubr.f32.mxu1 %v446_v45  ;;  %2082 = vmatpush3.bf16.msra.mxu1 %v2079_v40  ;;  %v2087_v45 = vpack.c.bf16 %v753_v44, %v752_v43  ;;  %v897_v43 = vld [vmem:[#allocation5 + $0x260] sm:$0xff]  ;;  %v898_v44 = vld [vmem:[#allocation5 + $0x268] sm:$0xff] }
 0x225   : > { %2084 = vmatprep.subr.bf16.mxu1 %v2083_v42 }
 0x226   : > { %v447_v46 = vld [vmem:[#allocation4 + $0x18] sm:$0xf] }
 0x227   : > { %1736 = vmatmul.mubr.f32.gmra.mrb[2].mxu1 %v447_v46  ;;  %v754_v46 = vld [vmem:[#allocation5 + $0x1b0] sm:$0xff] }
 0x228   : > { %2086 = vmatpush3.bf16.msra.mxu1 %v2083_v42  ;;  %v2091_v48 = vpack.c.bf16 %v755_v47, %v754_v46  ;;  %v2135_v46 = vpack.c.bf16 %v898_v44, %v897_v43  ;;  %v900_v47 = vld [vmem:[#allocation5 + $0x278] sm:$0xff]  ;;  %v1103_v43 = vld [vmem:[#allocation5 + $0x340] sm:$0xff]  ;;  %v1104_v44 = vld [vmem:[#allocation5 + $0x348] sm:$0xff] }
 0x229   : > { %2088 = vmatprep.subr.bf16.mxu1 %v2087_v45 }
 0x22c   : > { %2090 = vmatpush3.bf16.msra.mxu1 %v2087_v45  ;;  %v899_v45 = vld [vmem:[#allocation5 + $0x270] sm:$0xff] }
 0x22d   : > { %2092 = vmatprep.subr.bf16.mxu1 %v2091_v48 }
 0x230   : > { %2094 = vmatpush3.bf16.msra.mxu1 %v2091_v48  ;;  %v2139_v48 = vpack.c.bf16 %v900_v47, %v899_v45  ;;  %v2191_v45 = vpack.c.bf16 %v1104_v44, %v1103_v43  ;;  %v1106_v47 = vld [vmem:[#allocation5 + $0x358] sm:$0xff] }
 0x231   : > { %2096 = vmatprep.subr.bf16.mxu1 %v2095_v51 }
 0x234   : > { %2098 = vmatpush3.bf16.msra.mxu1 %v2095_v51 }
 0x2f6   : > { %v1734_v57 = vpop.f32.mrb[0].mxu1 }
 0x2f7   : > { %v541_v58 = vadd.f32 %v1734_v57, %v1484_v56  ;;  %v535_v59 = vpop.f32.mrb[1].mxu1  ;;  %v759_v57 = vld [vmem:[#allocation5 + $0x1d8] sm:$0xff] }
 0x2f8   : > { %v536_v60 = vadd.f32 %v1484_v56, %v535_v59 }
 0x2f9   : > { %v555_v61 = vmax.f32 %v541_v58, 0.0 }
 0x2fa   : > { %v554_v0 = vmax.f32 %v536_v60, 0.0  ;;  %v1737_v1 = vpop.f32.mrb[2].mxu1 }
 0x2fb   : > { %v563_v3 = vadd.f32 %v555_v61, %v393_v31  ;;  %v551_v4 = vadd.f32 %v1737_v1, %v1484_v56  ;;  %v545_v5 = vpop.f32.mrb[3].mxu1  ;;  %v2103_v1 = vpack.c.bf16 %v761_v63, %v760_v62  ;;  %v997_v63 = vld [vmem:[#allocation5 + $0x2b0] sm:$0xff] }
 0x2fc   : > { %v562_v6 = vadd.f32 %v554_v0, %v2439_v20  ;;  %v546_v7 = vadd.f32 %v1484_v56, %v545_v5  ;;  %v758_v56 = vld [vmem:[#allocation5 + $0x1d0] sm:$0xff] }
 0x2fd   : > { %567 = vst [vmem:[#allocation2 + $0x8] sm:$0xff] %v563_v3  ;;  %v557_v8 = vmax.f32 %v551_v4, 0.0  ;;  %v2099_v59 = vpack.c.bf16 %v759_v57, %v758_v56  ;;  %v762_v0 = vld [vmem:[#allocation5 + $0x1f0] sm:$0xff]  ;;  %v994_v56 = vld [vmem:[#allocation5 + $0x298] sm:$0xff] }
 0x2fe   : > { %566 = vst [vmem:[#allocation2] sm:$0xff] %v562_v6  ;;  %v556_v12 = vmax.f32 %v546_v7, 0.0  ;;  %v2107_v3 = vpack.c.bf16 %v763_v2, %v762_v0  ;;  %v998_v0 = vld [vmem:[#allocation5 + $0x2b8] sm:$0xff] }
 0x2ff   : > { %v565_v14 = vadd.f32 %v561_v11, %v557_v8  ;;  %2100 = vmatprep.subr.bf16.mxu1 %v2099_v59 }
 0x300   : > { %v564_v15 = vadd.f32 %v556_v12, %v2446_v30  ;;  %2102 = vmatpush3.bf16.msra.mxu1 %v2099_v59  ;;  %v995_v59 = vld [vmem:[#allocation5 + $0x2a0] sm:$0xff] }
 0x301   : > { %569 = vst [vmem:[#allocation2 + $0x18] sm:$0xf] %v565_v14  ;;  %2104 = vmatprep.subr.bf16.mxu1 %v2103_v1 }
 0x302   : > { %568 = vst [vmem:[#allocation2 + $0x10] sm:$0xff] %v564_v15  ;;  %v885_v15 = vld [vmem:[#allocation5 + $0x200] sm:$0xff] }
 0x303   : > { %v2111_v18 = vpack.c.bf16 %v886_v16, %v885_v15  ;;  %v1004_v15 = vld [vmem:[#allocation5 + $0x2e8] sm:$0xff] }
 0x304   : > { %2106 = vmatpush3.bf16.msra.mxu1 %v2103_v1  ;;  %v2155_v1 = vpack.c.bf16 %v998_v0, %v997_v63  ;;  %v1205_v0 = vld [vmem:[#allocation5 + $0x3b0] sm:$0xff] }
 0x305   : > { %v574_v19 = vld [vmem:[#allocation2 + $0x1] ss:$2 sm:$0xff]  ;;  %v570_v20 = vld [vmem:[#allocation2] ss:$2 sm:$0xff]  ;;  %2108 = vmatprep.subr.bf16.mxu1 %v2107_v3  ;;  %2112 = vmatprep.subr.bf16.mxu0 %v2111_v18 }
 0x306   : > { %582 = vrot.lane.b32.xlu0 %v574_v19, %s2344_s11  ;;  %577 = vst.msk [vmem:[#allocation4] sm:$0xff] %vm386_vm6, %v570_v20 }
 0x308   : > { %2110 = vmatpush3.bf16.msra.mxu1 %v2107_v3 }
 0x309   : > { %v576_v27 = vld [vmem:[#allocation2 + $0x11] ss:$2 sm:$0x3f]  ;;  %v572_v28 = vld [vmem:[#allocation2 + $0x10] ss:$2 sm:$0x3f] }
 0x30a   : > { %584 = vrot.lane.b32.xlu1 %v576_v27, %s2344_s11  ;;  %593 = vrot.lane.b32.xlu0 %v570_v20, %s2345_s14  ;;  %579 = vst.msk [vmem:[#allocation4 + $0x8] sm:$0x1f] %vm578_vm12, %v572_v28 }
 0x30e   : > { %595 = vrot.lane.b32.xlu1 %v572_v28, %s2345_s14  ;;  %603 = vrot.lane.b32.xlu0 %v574_v19, %s2346_s17  ;;  %v888_v19 = vld [vmem:[#allocation5 + $0x218] sm:$0xff]  ;;  %v894_v28 = vld [vmem:[#allocation5 + $0x248] sm:$0xff] }
 0x30f   : > { %v2115_v20 = vpack.c.bf16 %v888_v19, %v887_v17  ;;  %v1005_v17 = vld [vmem:[#allocation5 + $0x2f0] sm:$0xff] }
 0x312   : > { %605 = vrot.lane.b32.xlu1 %v576_v27, %s2346_s17  ;;  %v893_v27 = vld [vmem:[#allocation5 + $0x240] sm:$0xff] }
 0x378   : > { %v583_v29 = vpop.permute.xlu0 %582 }
 0x379   : > { %588 = vst.msk [vmem:[#allocation4] sm:$0xff] %vm412_vm8, %v583_v29  ;;  %v2127_v29 = vpack.c.bf16 %v894_v28, %v893_v27  ;;  %v1100_v27 = vld [vmem:[#allocation5 + $0x328] sm:$0xff] }
 0x37c   : > { %v585_v30 = vpop.permute.xlu1 %584  ;;  %v594_v31 = vpop.permute.xlu0 %593 }
 0x37d   : > { %590 = vst.msk [vmem:[#allocation4 + $0x8] sm:$0x1f] %vm589_vm13, %v585_v30  ;;  %v1486_v30 = vld [vmem:[%s2519_s2 + $0x3] ss:$0 sm:$0xff] }
 0x37e   : > { %600 = vst.msk [vmem:[#allocation4 - $0x1] sm:$0xfe] %vm599_vm14, %v594_v31 }
 0x380   : > { %v596_v32 = vpop.permute.xlu1 %595  ;;  %v604_v33 = vpop.permute.xlu0 %603 }
 0x381   : > { %602 = vst.msk [vmem:[#allocation4 + $0x7] sm:$0x3f] %vm601_vm15, %v596_v32 }
 0x382   : > { %610 = vst.msk [vmem:[#allocation4 - $0x1] sm:$0xfe] %vm609_vm0, %v604_v33 }
 0x384   : > { %v606_v34 = vpop.permute.xlu1 %605 }
 0x385   : > { %612 = vst.msk [vmem:[#allocation4 + $0x7] sm:$0x3f] %vm611_vm1, %v606_v34 }
 0x38c   : > { %v613_v35 = vld [vmem:[#allocation4] sm:$0xff]  ;;  %v614_v36 = vld [vmem:[#allocation4 + $0x8] sm:$0x1f] }
 0x38d   : > { %1770 = vmatprep.mubr.f32.mxu0 %v613_v35 }
 0x38e   : > { %1771 = vmatmul.mubr.f32.vlgmr.msra.gmra.mrb[4].mxu0 %v614_v36  ;;  %v895_v36 = vld [vmem:[#allocation5 + $0x250] sm:$0xff] }
 0x38f   : > { %2114 = vmatpush3.bf16.msra.mxu0 %v2111_v18  ;;  %v2131_v40 = vpack.c.bf16 %v896_v37, %v895_v36  ;;  %v1006_v18 = vld [vmem:[#allocation5 + $0x2f8] sm:$0xff] }
 0x390   : > { %2116 = vmatprep.subr.bf16.mxu0 %v2115_v20  ;;  %v2171_v19 = vpack.c.bf16 %v1006_v18, %v1005_v17  ;;  %v1210_v17 = vld [vmem:[#allocation5 + $0x3d8] sm:$0xff] }
 0x393   : > { %2118 = vmatpush3.bf16.msra.mxu0 %v2115_v20  ;;  %v1095_v20 = vld [vmem:[#allocation5 + $0x300] sm:$0xff] }
 0x394   : > { %2120 = vmatprep.subr.bf16.mxu0 %v2119_v23 }
 0x397   : > { %2122 = vmatpush3.bf16.msra.mxu0 %v2119_v23  ;;  %v2175_v23 = vpack.c.bf16 %v1096_v21, %v1095_v20  ;;  %v1212_v20 = vld [vmem:[#allocation5 + $0x3e8] sm:$0xff] }
 0x398   : > { %2124 = vmatprep.subr.bf16.mxu0 %v2123_v26 }
 0x39b   : > { %2126 = vmatpush3.bf16.msra.mxu0 %v2123_v26  ;;  %v1099_v26 = vld [vmem:[#allocation5 + $0x320] sm:$0xff] }
 0x39c   : > { %2128 = vmatprep.subr.bf16.mxu0 %v2127_v29  ;;  %v2183_v28 = vpack.c.bf16 %v1100_v27, %v1099_v26  ;;  %v1304_v26 = vld [vmem:[#allocation5 + $0x408] sm:$0xff]  ;;  %v1305_v27 = vld [vmem:[#allocation5 + $0x410] sm:$0xff] }
 0x39f   : > { %2130 = vmatpush3.bf16.msra.mxu0 %v2127_v29  ;;  %v1101_v29 = vld [vmem:[#allocation5 + $0x330] sm:$0xff] }
 0x3a0   : > { %2132 = vmatprep.subr.bf16.mxu0 %v2131_v40 }
 0x3a3   : > { %2134 = vmatpush3.bf16.msra.mxu0 %v2131_v40 }
 0x3a4   : > { %2136 = vmatprep.subr.bf16.mxu0 %v2135_v46 }
 0x3a7   : > { %2138 = vmatpush3.bf16.msra.mxu0 %v2135_v46  ;;  %v1105_v46 = vld [vmem:[#allocation5 + $0x350] sm:$0xff] }
 0x3a8   : > { %2140 = vmatprep.subr.bf16.mxu0 %v2139_v48 }
 0x3ab   : > { %2142 = vmatpush3.bf16.msra.mxu0 %v2139_v48  ;;  %v2195_v48 = vpack.c.bf16 %v1106_v47, %v1105_v46  ;;  %v1311_v47 = vld [vmem:[#allocation5 + $0x440] sm:$0xff] }
 0x3ac   : > { %2176 = vmatprep.subr.bf16.mxu0 %v2175_v23 }
 0x461   : > { %v1772_v53 = vpop.f32.mrb[4].mxu0 }
 0x462   : > { %v708_v54 = vadd.f32 %v1772_v53, %v1485_v52  ;;  %v702_v55 = vpop.f32.mrb[5].mxu0  ;;  %v992_v53 = vld [vmem:[#allocation5 + $0x288] sm:$0xff] }
 0x463   : > { %v703_v58 = vadd.f32 %v1485_v52, %v702_v55  ;;  %v991_v52 = vld [vmem:[#allocation5 + $0x280] sm:$0xff] }
 0x464   : > { %v712_v60 = vmax.f32 %v708_v54, 0.0  ;;  %v993_v54 = vld [vmem:[#allocation5 + $0x290] sm:$0xff]  ;;  %v2143_v55 = vpack.c.bf16 %v992_v53, %v991_v52 }
 0x465   : > { %v711_v61 = vmax.f32 %v703_v58, 0.0  ;;  %v2147_v58 = vpack.c.bf16 %v994_v56, %v993_v54  ;;  %v1109_v53 = vld [vmem:[#allocation5 + $0x370] sm:$0xff]  ;;  %v1110_v54 = vld [vmem:[#allocation5 + $0x378] sm:$0xff]  ;;  %v1200_v56 = vld [vmem:[#allocation5 + $0x388] sm:$0xff] }
 0x466   : > { %714 = vst [vmem:[#allocation3 + $0x8] sm:$0x1f] %v712_v60  ;;  %v996_v60 = vld [vmem:[#allocation5 + $0x2a8] sm:$0xff]  ;;  %2144 = vmatprep.subr.bf16.mxu1 %v2143_v55 }
 0x467   : > { %713 = vst [vmem:[#allocation3] sm:$0xff] %v711_v61  ;;  %717 = vst.msk [vmem:[#allocation4] sm:$0xff] %vm386_vm6, %v711_v61  ;;  %v2151_v62 = vpack.c.bf16 %v996_v60, %v995_v59  ;;  %v1202_v59 = vld [vmem:[#allocation5 + $0x398] sm:$0xff] }
 0x46d   : > { %v721_v4 = vld [vmem:[#allocation3 + $0x9] sm:$0x7] }
 0x46e   : > { %v716_v5 = vld [vmem:[#allocation3 + $0x8] sm:$0x7]  ;;  %726 = vrot.lane.b32.xlu1 %v721_v4, %s2344_s11 }
 0x46f   : > { %v720_v6 = vld [vmem:[#allocation3 + $0x1] sm:$0xff]  ;;  %719 = vst.msk [vmem:[#allocation4 + $0x8] sm:$0x7] %vm718_vm2, %v716_v5  ;;  %v734_v7 = vld [vmem:[#allocation3 + $0xa] sm:$0x7] }
 0x470   : > { %724 = vrot.lane.b32.xlu0 %v720_v6, %s2344_s11  ;;  %v733_v8 = vld [vmem:[#allocation3 + $0x2] sm:$0xff] }
 0x471   : > { %v847_v38 = vld [vmem:[#allocation3 + $0x9] sm:$0x7] }
 0x472   : > { %739 = vrot.lane.b32.xlu1 %v734_v7, %s2345_s14 }
 0x474   : > { %737 = vrot.lane.b32.xlu0 %v733_v8, %s2345_s14  ;;  %v999_v8 = vld [vmem:[#allocation5 + $0x2c0] sm:$0xff] }
 0x4e0   : > { %v727_v9 = vpop.permute.xlu1 %726 }
 0x4e1   : > { %732 = vst.msk [vmem:[#allocation4 + $0x8] sm:$0x7] %vm731_vm3, %v727_v9  ;;  %v1000_v9 = vld [vmem:[#allocation5 + $0x2c8] sm:$0xff] }
 0x4e2   : > { %v725_v10 = vpop.permute.xlu0 %724 }
 0x4e3   : > { %730 = vst.msk [vmem:[#allocation4] sm:$0xff] %vm412_vm8, %v725_v10  ;;  %v2159_v10 = vpack.c.bf16 %v1000_v9, %v999_v8 }
 0x4e4   : > { %v740_v11 = vpop.permute.xlu1 %739 }
 0x4e5   : > { %745 = vst.msk [vmem:[#allocation4 + $0x8] sm:$0x7] %vm744_vm4, %v740_v11  ;;  %v1001_v11 = vld [vmem:[#allocation5 + $0x2d0] sm:$0xff] }
 0x4e6   : > { %v738_v12 = vpop.permute.xlu0 %737 }
 0x4e7   : > { %743 = vst.msk [vmem:[#allocation4] sm:$0xff] %vm438_vm9, %v738_v12  ;;  %v1002_v12 = vld [vmem:[#allocation5 + $0x2d8] sm:$0xff] }
 0x4ec   : > { %v747_v14 = vld [vmem:[#allocation4 + $0x8] sm:$0x7] }
 0x4ee   : > { %v746_v13 = vld [vmem:[#allocation4] sm:$0xff] }
 0x4ef   : > { %1805 = vmatprep.mubr.f32.mxu1 %v746_v13  ;;  %v2163_v13 = vpack.c.bf16 %v1002_v12, %v1001_v11 }
 0x4f0   : > { %1806 = vmatmul.mubr.f32.vlgmr.msra.gmra.mrb[4].mxu1 %v747_v14  ;;  %v1003_v14 = vld [vmem:[#allocation5 + $0x2e0] sm:$0xff] }
 0x4f1   : > { %2146 = vmatpush3.bf16.msra.mxu1 %v2143_v55  ;;  %v2167_v16 = vpack.c.bf16 %v1004_v15, %v1003_v14  ;;  %v1199_v55 = vld [vmem:[#allocation5 + $0x380] sm:$0xff]  ;;  %v1208_v14 = vld [vmem:[#allocation5 + $0x3c8] sm:$0xff] }
 0x4f2   : > { %2148 = vmatprep.subr.bf16.mxu1 %v2147_v58 }
 0x4f5   : > { %2150 = vmatpush3.bf16.msra.mxu1 %v2147_v58  ;;  %v2207_v58 = vpack.c.bf16 %v1200_v56, %v1199_v55  ;;  %v1317_v56 = vld [vmem:[#allocation5 + $0x470] sm:$0xff] }
 0x4f6   : > { %2152 = vmatprep.subr.bf16.mxu1 %v2151_v62 }
 0x4f9   : > { %2154 = vmatpush3.bf16.msra.mxu1 %v2151_v62  ;;  %v1204_v62 = vld [vmem:[#allocation5 + $0x3a8] sm:$0xff] }
 0x4fa   : > { %2156 = vmatprep.subr.bf16.mxu1 %v2155_v1 }
 0x4fd   : > { %2158 = vmatpush3.bf16.msra.mxu1 %v2155_v1  ;;  %v1206_v1 = vld [vmem:[#allocation5 + $0x3b8] sm:$0xff] }
 0x4fe   : > { %2160 = vmatprep.subr.bf16.mxu1 %v2159_v10 }
 0x501   : > { %2162 = vmatpush3.bf16.msra.mxu1 %v2159_v10 }
 0x502   : > { %2164 = vmatprep.subr.bf16.mxu1 %v2163_v13 }
 0x505   : > { %2166 = vmatpush3.bf16.msra.mxu1 %v2163_v13  ;;  %v1207_v13 = vld [vmem:[#allocation5 + $0x3c0] sm:$0xff] }
 0x506   : > { %2168 = vmatprep.subr.bf16.mxu1 %v2167_v16  ;;  %v2223_v15 = vpack.c.bf16 %v1208_v14, %v1207_v13 }
 0x509   : > { %2170 = vmatpush3.bf16.msra.mxu1 %v2167_v16  ;;  %v1209_v16 = vld [vmem:[#allocation5 + $0x3d0] sm:$0xff] }
 0x50a   : > { %2172 = vmatprep.subr.bf16.mxu1 %v2171_v19  ;;  %v2227_v18 = vpack.c.bf16 %v1210_v17, %v1209_v16 }
 0x50d   : > { %2174 = vmatpush3.bf16.msra.mxu1 %v2171_v19  ;;  %v1211_v19 = vld [vmem:[#allocation5 + $0x3e0] sm:$0xff] }
 0x50e   : > { %2208 = vmatprep.subr.bf16.mxu1 %v2207_v58  ;;  %v2231_v21 = vpack.c.bf16 %v1212_v20, %v1211_v19 }
 0x5c3   : > { %v1807_v31 = vpop.f32.mrb[4].mxu1 }
 0x5c4   : > { %v841_v32 = vadd.f32 %v1807_v31, %v1486_v30  ;;  %v835_v33 = vpop.f32.mrb[5].mxu1 }
 0x5c5   : > { %v836_v34 = vadd.f32 %v1486_v30, %v835_v33  ;;  %v1102_v30 = vld [vmem:[#allocation5 + $0x338] sm:$0xff] }
 0x5c6   : > { %v845_v35 = vmax.f32 %v841_v32, 0.0  ;;  %v2187_v31 = vpack.c.bf16 %v1102_v30, %v1101_v29  ;;  %v1487_v32 = vld [vmem:[%s2519_s2 + $0x4] ss:$0 sm:$0xff]  ;;  %v1306_v29 = vld [vmem:[#allocation5 + $0x418] sm:$0xff] }
 0x5c7   : > { %v844_v39 = vmax.f32 %v836_v34, 0.0  ;;  %v2243_v30 = vpack.c.bf16 %v1306_v29, %v1305_v27 }
 0x5c8   : > { %v849_v41 = vadd.f32 %v847_v38, %v845_v35 }
 0x5c9   : > { %v848_v42 = vadd.f32 %v844_v39, %v720_v6 }
 0x5ca   : > { %851 = vst [vmem:[#allocation2 + $0x8] sm:$0x7] %v849_v41 }
 0x5cb   : > { %850 = vst [vmem:[#allocation2] sm:$0xff] %v848_v42  ;;  %854 = vst.msk [vmem:[#allocation4] sm:$0xff] %vm386_vm6, %v848_v42  ;;  %vm868_vm6 = vcmask 516352  }
 0x5d1   : > { %v858_v49 = vld [vmem:[#allocation2 + $0x9] sm:$0x1]  ;;  %v853_v50 = vld [vmem:[#allocation2 + $0x8] sm:$0x1]  ;;  %v871_v57 = vld [vmem:[#allocation2 + $0xa] sm:$0x1] }
 0x5d2   : > { %863 = vrot.lane.b32.xlu1 %v858_v49, %s2344_s11  ;;  %v2486_v51 = vld [vmem:[#allocation2 + $0x1] sm:$0xff]  ;;  %856 = vst.msk [vmem:[#allocation4 + $0x8] sm:$0x1] %vm855_vm5, %v853_v50  ;;  %v984_v38 = vld [vmem:[#allocation2 + $0x9] sm:$0x1] }
 0x5d3   : > { %861 = vrot.lane.b32.xlu0 %v2486_v51, %s2344_s11  ;;  %v870_v61 = vld [vmem:[#allocation2 + $0x2] sm:$0xff] }
 0x5d4   : > { %v1107_v49 = vld [vmem:[#allocation5 + $0x360] sm:$0xff]  ;;  %v1108_v50 = vld [vmem:[#allocation5 + $0x368] sm:$0xff] }
 0x5d5   : > { %v2199_v52 = vpack.c.bf16 %v1108_v50, %v1107_v49  ;;  %v1313_v50 = vld [vmem:[#allocation5 + $0x450] sm:$0xff] }
 0x5d6   : > { %876 = vrot.lane.b32.xlu1 %v871_v57, %s2345_s14  ;;  %v1201_v57 = vld [vmem:[#allocation5 + $0x390] sm:$0xff] }
 0x5d7   : > { %874 = vrot.lane.b32.xlu0 %v870_v61, %s2345_s14  ;;  %v2211_v60 = vpack.c.bf16 %v1202_v59, %v1201_v57  ;;  %v1203_v61 = vld [vmem:[#allocation5 + $0x3a0] sm:$0xff]  ;;  %v1318_v57 = vld [vmem:[#allocation5 + $0x478] sm:$0xff] }
 0x5d8   : > { %v2215_v63 = vpack.c.bf16 %v1204_v62, %v1203_v61  ;;  %v1490_v59 = vld [vmem:[%s2519_s2 + $0x7] ss:$0 sm:$0xff] }
 0x644   : > { %v864_v2 = vpop.permute.xlu1 %863 }
 0x645   : > { %869 = vst.msk [vmem:[#allocation4 + $0x8] sm:$0x1] %vm868_vm6, %v864_v2  ;;  %v862_v3 = vpop.permute.xlu0 %861  ;;  %v2219_v2 = vpack.c.bf16 %v1206_v1, %v1205_v0 }
 0x646   : > { %867 = vst.msk [vmem:[#allocation4] sm:$0xff] %vm412_vm8, %v862_v3  ;;  %v1488_v3 = vld [vmem:[%s2519_s2 + $0x5] ss:$0 sm:$0xff] }
 0x648   : > { %v877_v4 = vpop.permute.xlu1 %876 }
 0x649   : > { %882 = vst.msk [vmem:[#allocation4 + $0x8] sm:$0x1] %vm881_vm7, %v877_v4  ;;  %v875_v5 = vpop.permute.xlu0 %874 }
 0x64a   : > { %880 = vst.msk [vmem:[#allocation4] sm:$0xff] %vm438_vm9, %v875_v5 }
 0x650   : > { %v884_v7 = vld [vmem:[#allocation4 + $0x8] sm:$0x1] }
 0x651   : > { %v883_v6 = vld [vmem:[#allocation4] sm:$0xff] }
 0x652   : > { %1840 = vmatprep.mubr.f32.mxu0 %v883_v6 }
 0x653   : > { %1841 = vmatmul.mubr.f32.vlgmr.msra.gmra.mrb[6].mxu0 %v884_v7 }
 0x654   : > { %2178 = vmatpush3.bf16.msra.mxu0 %v2175_v23  ;;  %v1214_v23 = vld [vmem:[#allocation5 + $0x3f8] sm:$0xff] }
 0x655   : > { %2180 = vmatprep.subr.bf16.mxu0 %v2179_v25  ;;  %v2235_v24 = vpack.c.bf16 %v1214_v23, %v1213_v22 }
 0x658   : > { %2182 = vmatpush3.bf16.msra.mxu0 %v2179_v25  ;;  %v1303_v25 = vld [vmem:[#allocation5 + $0x400] sm:$0xff] }
 0x659   : > { %2184 = vmatprep.subr.bf16.mxu0 %v2183_v28 }
 0x65c   : > { %2186 = vmatpush3.bf16.msra.mxu0 %v2183_v28  ;;  %v2239_v28 = vpack.c.bf16 %v1304_v26, %v1303_v25 }
 0x65d   : > { %2188 = vmatprep.subr.bf16.mxu0 %v2187_v31 }
 0x660   : > { %2190 = vmatpush3.bf16.msra.mxu0 %v2187_v31  ;;  %v1307_v31 = vld [vmem:[#allocation5 + $0x420] sm:$0xff] }
 0x661   : > { %2192 = vmatprep.subr.bf16.mxu0 %v2191_v45 }
 0x664   : > { %2194 = vmatpush3.bf16.msra.mxu0 %v2191_v45 }
 0x665   : > { %2196 = vmatprep.subr.bf16.mxu0 %v2195_v48 }
 0x668   : > { %2198 = vmatpush3.bf16.msra.mxu0 %v2195_v48  ;;  %v1312_v48 = vld [vmem:[#allocation5 + $0x448] sm:$0xff] }
 0x669   : > { %2200 = vmatprep.subr.bf16.mxu0 %v2199_v52  ;;  %v2255_v49 = vpack.c.bf16 %v1312_v48, %v1311_v47 }
 0x66c   : > { %2202 = vmatpush3.bf16.msra.mxu0 %v2199_v52  ;;  %v1314_v52 = vld [vmem:[#allocation5 + $0x458] sm:$0xff] }
 0x726   : > { %v1842_v33 = vpop.f32.mrb[6].mxu0 }
 0x727   : > { %v978_v34 = vadd.f32 %v1842_v33, %v1487_v32  ;;  %v972_v35 = vpop.f32.mrb[7].mxu0 }
 0x728   : > { %v973_v36 = vadd.f32 %v1487_v32, %v972_v35  ;;  %v1308_v32 = vld [vmem:[#allocation5 + $0x428] sm:$0xff]  ;;  %v1310_v35 = vld [vmem:[#allocation5 + $0x438] sm:$0xff] }
 0x729   : > { %v982_v37 = vmax.f32 %v978_v34, 0.0  ;;  %v2247_v33 = vpack.c.bf16 %v1308_v32, %v1307_v31  ;;  %v1309_v34 = vld [vmem:[#allocation5 + $0x430] sm:$0xff] }
 0x72a   : > { %v981_v39 = vmax.f32 %v973_v36, 0.0  ;;  %v2251_v36 = vpack.c.bf16 %v1310_v35, %v1309_v34 }
 0x72b   : > { %v986_v40 = vadd.f32 %v984_v38, %v982_v37  ;;  %v1489_v37 = vld [vmem:[%s2519_s2 + $0x6] ss:$0 sm:$0xff] }
 0x72c   : > { %v985_v41 = vadd.f32 %v981_v39, %v2486_v51  ;;  %v2203_v51 = vpack.c.bf16 %v1110_v54, %v1109_v53  ;;  %v2259_v53 = vpack.c.bf16 %v1314_v52, %v1313_v50  ;;  %v1315_v54 = vld [vmem:[#allocation5 + $0x460] sm:$0xff] }
 0x72d   : > { %988 = vst [vmem:[#allocation3 + $0x8] sm:$0x1] %v986_v40 }
 0x72e   : > { %1875 = vmatprep.mubr.f32.mxu1 %v985_v41  ;;  %2204 = vmatprep.subr.bf16.mxu0 %v2203_v51 }
 0x72f   : > { %2206 = vmatpush3.bf16.msra.mxu0 %v2203_v51  ;;  %v1316_v51 = vld [vmem:[#allocation5 + $0x468] sm:$0xff] }
 0x730   : > { %2240 = vmatprep.subr.bf16.mxu0 %v2239_v28  ;;  %v2263_v55 = vpack.c.bf16 %v1316_v51, %v1315_v54 }
 0x734   : > { %v990_v42 = vld [vmem:[#allocation3 + $0x8] sm:$0x1] }
 0x735   : > { %1876 = vmatmul.mubr.f32.vlgmr.msra.gmra.mrb[6].mxu1 %v990_v42 }
 0x736   : > { %2210 = vmatpush3.bf16.msra.mxu1 %v2207_v58  ;;  %v2267_v58 = vpack.c.bf16 %v1318_v57, %v1317_v56 }
 0x737   : > { %2212 = vmatprep.subr.bf16.mxu1 %v2211_v60 }
 0x73a   : > { %2214 = vmatpush3.bf16.msra.mxu1 %v2211_v60 }
 0x73b   : > { %2216 = vmatprep.subr.bf16.mxu1 %v2215_v63 }
 0x73e   : > { %2218 = vmatpush3.bf16.msra.mxu1 %v2215_v63 }
 0x73f   : > { %2220 = vmatprep.subr.bf16.mxu1 %v2219_v2 }
 0x742   : > { %2222 = vmatpush3.bf16.msra.mxu1 %v2219_v2 }
 0x743   : > { %2224 = vmatprep.subr.bf16.mxu1 %v2223_v15 }
 0x746   : > { %2226 = vmatpush3.bf16.msra.mxu1 %v2223_v15 }
 0x747   : > { %2228 = vmatprep.subr.bf16.mxu1 %v2227_v18 }
 0x74a   : > { %2230 = vmatpush3.bf16.msra.mxu1 %v2227_v18 }
 0x74b   : > { %2232 = vmatprep.subr.bf16.mxu1 %v2231_v21 }
 0x74e   : > { %2234 = vmatpush3.bf16.msra.mxu1 %v2231_v21 }
 0x74f   : > { %2236 = vmatprep.subr.bf16.mxu1 %v2235_v24 }
 0x752   : > { %2238 = vmatpush3.bf16.msra.mxu1 %v2235_v24 }
 0x808   : > { %v1877_v4 = vpop.f32.mrb[6].mxu1 }
 0x809   : > { %v1084_v5 = vadd.f32 %v1877_v4, %v1488_v3  ;;  %v1078_v6 = vpop.f32.mrb[7].mxu1 }
 0x80a   : > { %v1079_v7 = vadd.f32 %v1488_v3, %v1078_v6 }
 0x80b   : > { %v1088_v8 = vmax.f32 %v1084_v5, 0.0  ;;  %v1491_v5 = vld [vmem:[%s2519_s2 + $0x8] ss:$0 sm:$0xff] }
 0x80c   : > { %v1087_v9 = vmax.f32 %v1079_v7, 0.0 }
 0x80d   : > { %v1090_v10 = vadd.f32 %v1088_v8, %v990_v42 }
 0x80e   : > { %v1089_v11 = vadd.f32 %v1087_v9, %v985_v41 }
 0x80f   : > { %1092 = vst [vmem:[#allocation2 + $0x8] sm:$0x1] %v1090_v10 }
 0x810   : > { %1910 = vmatprep.mubr.f32.mxu0 %v1089_v11 }
 0x816   : > { %v1094_v12 = vld [vmem:[#allocation2 + $0x8] sm:$0x1] }
 0x817   : > { %1911 = vmatmul.mubr.f32.vlgmr.msra.gmra.mrb[8].mxu0 %v1094_v12 }
 0x818   : > { %2242 = vmatpush3.bf16.msra.mxu0 %v2239_v28 }
 0x819   : > { %2244 = vmatprep.subr.bf16.mxu0 %v2243_v30 }
 0x81c   : > { %2246 = vmatpush3.bf16.msra.mxu0 %v2243_v30 }
 0x81d   : > { %2248 = vmatprep.subr.bf16.mxu0 %v2247_v33 }
 0x820   : > { %2250 = vmatpush3.bf16.msra.mxu0 %v2247_v33 }
 0x821   : > { %2252 = vmatprep.subr.bf16.mxu0 %v2251_v36 }
 0x824   : > { %2254 = vmatpush3.bf16.msra.mxu0 %v2251_v36 }
 0x825   : > { %2256 = vmatprep.subr.bf16.mxu0 %v2255_v49 }
 0x828   : > { %2258 = vmatpush3.bf16.msra.mxu0 %v2255_v49 }
 0x829   : > { %2260 = vmatprep.subr.bf16.mxu0 %v2259_v53 }
 0x82c   : > { %2262 = vmatpush3.bf16.msra.mxu0 %v2259_v53 }
 0x82d   : > { %2264 = vmatprep.subr.bf16.mxu0 %v2263_v55 }
 0x830   : > { %2266 = vmatpush3.bf16.msra.mxu0 %v2263_v55 }
 0x831   : > { %2268 = vmatprep.subr.bf16.mxu0 %v2267_v58 }
 0x834   : > { %2270 = vmatpush3.bf16.msra.mxu0 %v2267_v58 }
 0x8ea   : > { %v1912_v38 = vpop.f32.mrb[8].mxu0 }
 0x8eb   : > { %v1188_v39 = vadd.f32 %v1912_v38, %v1489_v37  ;;  %v1182_v40 = vpop.f32.mrb[9].mxu0 }
 0x8ec   : > { %v1183_v41 = vadd.f32 %v1489_v37, %v1182_v40 }
 0x8ed   : > { %v1192_v42 = vmax.f32 %v1188_v39, 0.0 }
 0x8ee   : > { %v1191_v43 = vmax.f32 %v1183_v41, 0.0 }
 0x8ef   : > { %v1194_v44 = vadd.f32 %v1192_v42, %v1094_v12 }
 0x8f0   : > { %v1193_v45 = vadd.f32 %v1191_v43, %v1089_v11 }
 0x8f1   : > { %1196 = vst [vmem:[#allocation3 + $0x8] sm:$0x1] %v1194_v44 }
 0x8f2   : > { %1195 = vst [vmem:[#allocation3] sm:$0xff] %v1193_v45  ;;  %1945 = vmatprep.mubr.f32.mxu1 %v1193_v45 }
 0x8f8   : > { %v1198_v46 = vld [vmem:[#allocation3 + $0x8] sm:$0x1] }
 0x8f9   : > { %1946 = vmatmul.mubr.f32.vlgmr.msra.gmra.mrb[8].mxu1 %v1198_v46 }
 0x9cc   : > { %v1947_v60 = vpop.f32.mrb[8].mxu1 }
 0x9cd   : > { %v1292_v61 = vadd.f32 %v1947_v60, %v1490_v59  ;;  %v1286_v62 = vpop.f32.mrb[9].mxu1 }
 0x9ce   : > { %v1287_v63 = vadd.f32 %v1490_v59, %v1286_v62 }
 0x9cf   : > { %v1296_v0 = vmax.f32 %v1292_v61, 0.0 }
 0x9d0   : > { %v1295_v1 = vmax.f32 %v1287_v63, 0.0 }
 0x9d1   : > { %v1298_v2 = vadd.f32 %v1296_v0, %v1198_v46 }
 0x9d2   : > { %v1297_v3 = vadd.f32 %v1295_v1, %v1193_v45 }
 0x9d3   : > { %1300 = vst [vmem:[#allocation2 + $0x8] sm:$0x1] %v1298_v2 }
 0x9d4   : > { %1299 = vst [vmem:[#allocation2] sm:$0xff] %v1297_v3  ;;  %1980 = vmatprep.mubr.f32.mxu0 %v1297_v3 }
 0x9da   : > { %v1302_v4 = vld [vmem:[#allocation2 + $0x8] sm:$0x1] }
 0x9db   : > { %1981 = vmatmul.mubr.f32.vlgmr.msra.gmra.mrb[10].mxu0 %v1302_v4 }
 0xaae   : > { %v1982_v6 = vpop.f32.mrb[10].mxu0 }
 0xaaf   : > { %v1396_v7 = vadd.f32 %v1982_v6, %v1491_v5  ;;  %v1390_v8 = vpop.f32.mrb[11].mxu0 }
 0xab0   : > { %v1391_v9 = vadd.f32 %v1491_v5, %v1390_v8 }
 0xab1   : > { %v1400_v10 = vmax.f32 %v1396_v7, 0.0 }
 0xab2   : > { %v1399_v11 = vmax.f32 %v1391_v9, 0.0 }
 0xab3   : > { %v1402_v12 = vadd.f32 %v1400_v10, %v1302_v4 }
 0xab4   : > { %v1401_v13 = vadd.f32 %v1399_v11, %v1297_v3 }
 0xab5   : > { %1404 = vst [vmem:[%s185_s8 + $0x8] sm:$0x1] %v1402_v12 }
 0xab6   : > { %1403 = vst [vmem:[%s185_s8] sm:$0xff] %v1401_v13 }
 0xab7 PF: > { %s14_s12 = sadd.s32 1, %s2336_s12  }
 0xab8   : > { %p11_p3 = scmp.ge.s32.totalorder %s14_s12, 4  }
 0xaba   :  { %13 = sbr.rel (!%p11_p3) target bundleno = 1 (0x1), region = 70 }
 0xac1   :  { %1426 = vsyncpa [#allocation6], 1 }
 0xac2   :  { %1428 = vsyncpa [#allocation6 + $0x1], 1 }

</bundles_post_ra>
